<compile_context>
chip_gen: v7x
topology: tpu7x:2x2x1
jax: 0.10.0
libtpu: 0.0.40
codegen_flags: <defaults>
</compile_context>

<pallas_src>
import functools
import math

import jax
import jax.numpy as jnp
from jax.experimental import pallas as pl
from jax.experimental.pallas import tpu as pltpu


# ------------------------- packed-column layouts -----------------------------

def _stem_col_layout(d_model, d_out):
  return (('b_in', d_model), ('ln_in2_g', d_model), ('ln_in2_b', d_model),
          ('b_out', d_out), ('ln_out_g', d_out), ('ln_out_b', d_out))


def _layer_col_layout(d_model, d_ff):
  return (('b_qkv', 3 * d_model), ('b_o', d_model),
          ('ln1_g', d_model), ('ln1_b', d_model),
          ('b_ff1', d_ff), ('b_ff2', d_model),
          ('ln2_g', d_model), ('ln2_b', d_model))


def _pack_cols(cols, layout):
  return jnp.concatenate(
      [cols[name].reshape(size, 1).astype(jnp.float32) for name, size in layout],
      axis=0)


def _unpack_cols(packed, layout):
  out, off = {}, 0
  for name, size in layout:
    out[name] = packed[off:off + size]
    off += size
  return out


# --------------------------- fused Pallas kernel -----------------------------

def _bottleneck_kernel(
    xT_ref, pe_ref, w_inT_ref, w_qkvT_ref, w_oT_ref, w_ff1T_ref, w_ff2T_ref,
    w_outT_ref, stem_cols_ref, layer_cols_ref, outT_ref,
    *, n_heads, batch, eps):
  f32 = jnp.float32
  B = batch
  D = pe_ref.shape[0]
  N = pe_ref.shape[1]
  S = N // B
  d_ff = w_ff1T_ref.shape[1]
  d_out = outT_ref.shape[0]
  n_layers = w_qkvT_ref.shape[0]
  hd = D // n_heads

  def normalize(x):
    # One-pass LayerNorm statistics over the feature axis (axis 0, sublanes):
    # E[x] and E[x^2] computed together, var = E[x^2] - mu^2.
    mu = jnp.mean(x, axis=0, keepdims=True)
    ms = jnp.mean(x * x, axis=0, keepdims=True)
    return (x - mu) * jax.lax.rsqrt(ms - mu * mu + eps)

  def layer_norm(x, g, b):
    return normalize(x) * g + b

  def linear(wT, x, b):
    # y^T = W^T @ x^T + b ; wT: bf16 [dout, din], x: f32 [din, N], b: [dout, 1]
    # bf16 operands -> single-pass MXU, f32 accumulation.
    return jnp.dot(wT, x.astype(wT.dtype), preferred_element_type=f32) + b

  stem = _unpack_cols(stem_cols_ref[...], _stem_col_layout(D, d_out))

  # ---- input stem: LN (affine folded into W_in/b_in) -> Linear -> LN -> +PE
  h = linear(w_inT_ref[...], normalize(xT_ref[...].astype(f32)), stem['b_in'])
  h = layer_norm(h, stem['ln_in2_g'], stem['ln_in2_b']) + pe_ref[...]

  # ---- transformer encoder layers (unrolled; weights resident in VMEM) ----
  # TODO(synk): switch to lax.fori_loop over the stacked weight refs if
  # n_layers grows large (vreg pressure / compile time); neutral at depth 2.
  for l in range(n_layers):
    lc = _unpack_cols(layer_cols_ref[l], _layer_col_layout(D, d_ff))

    qkv = linear(w_qkvT_ref[l], h, lc['b_qkv'])      # [3D, N]
    qT = qkv[0:D]                                    # 1/sqrt(hd) folded into W_q
    kT = qkv[D:2 * D]
    vT = qkv[2 * D:3 * D]

    # Attention over the *batch* axis (PyTorch batch_first=False quirk), at
    # full lane width: rolling K/V by m*S lanes pairs every query (b, s) with
    # the key/value of batch ((b -/+ m) mod B, s); softmax over the B
    # rotations is exactly softmax over the key batches (order-invariant).
    scores, v_rolls = [], []
    for m in range(B):
      k_m = kT if m == 0 else pltpu.roll(kT, shift=m * S, axis=1)
      v_m = vT if m == 0 else pltpu.roll(vT, shift=m * S, axis=1)
      v_rolls.append(v_m.reshape(n_heads, hd, N))
      scores.append(jnp.sum((qT * k_m).reshape(n_heads, hd, N), axis=1))

    s_max = scores[0]
    for m in range(1, B):
      s_max = jnp.maximum(s_max, scores[m])
    es = [jnp.exp(s - s_max) for s in scores]
    denom = es[0]
    for m in range(1, B):
      denom = denom + es[m]
    inv = pl.reciprocal(denom, approx=True)          # EUP slot; VALU stays free
    acc = es[0][:, None, :] * v_rolls[0]
    for m in range(1, B):
      acc = acc + es[m][:, None, :] * v_rolls[m]
    attn = (acc * inv[:, None, :]).reshape(D, N)     # [D, N]

    h = layer_norm(h + linear(w_oT_ref[l], attn, lc['b_o']),
                   lc['ln1_g'], lc['ln1_b'])
    ff = jnp.maximum(linear(w_ff1T_ref[l], h, lc['b_ff1']), 0.0)
    h = layer_norm(h + linear(w_ff2T_ref[l], ff, lc['b_ff2']),
                   lc['ln2_g'], lc['ln2_b'])

  # ---- output stem: final encoder LN (affine folded) -> Linear -> LN ------
  out = linear(w_outT_ref[...], normalize(h), stem['b_out'])
  out = layer_norm(out, stem['ln_out_g'], stem['ln_out_b'])
  outT_ref[...] = out.astype(outT_ref.dtype)          # [dout, N] lane-dense


# ------------------------------- parameters ----------------------------------

def init_params(key, feat_in, feat_out, n_layers, d_model, n_heads,
                ff_expansion, patch_size):
  din = patch_size ** 2 * feat_in
  dout = patch_size ** 2 * feat_out
  dff = ff_expansion * d_model
  keys = iter(jax.random.split(key, 16 + 16 * n_layers))

  def dense(i, o):
    return (jax.random.normal(next(keys), (i, o), jnp.float32) * 0.02,
            jax.random.normal(next(keys), (o,), jnp.float32) * 0.02)

  def ln(d):
    return (1.0 + 0.05 * jax.random.normal(next(keys), (d,), jnp.float32),
            0.05 * jax.random.normal(next(keys), (d,), jnp.float32))

  p = {}
  p['ln_in_g'], p['ln_in_b'] = ln(din)
  p['w_in'], p['b_in'] = dense(din, d_model)
  p['ln_in2_g'], p['ln_in2_b'] = ln(d_model)
  layers = []
  for _ in range(n_layers):
    lp = {}
    lp['w_qkv'], lp['b_qkv'] = dense(d_model, 3 * d_model)
    lp['w_o'], lp['b_o'] = dense(d_model, d_model)
    lp['ln1_g'], lp['ln1_b'] = ln(d_model)
    lp['w_ff1'], lp['b_ff1'] = dense(d_model, dff)
    lp['w_ff2'], lp['b_ff2'] = dense(dff, d_model)
    lp['ln2_g'], lp['ln2_b'] = ln(d_model)
    layers.append(lp)
  p['layers'] = layers
  p['ln_f_g'], p['ln_f_b'] = ln(d_model)
  p['w_out'], p['b_out'] = dense(d_model, dout)
  p['ln_out_g'], p['ln_out_b'] = ln(dout)
  return p


def make_pe(max_len, d_model):
  pos = jnp.arange(max_len, dtype=jnp.float32)[:, None]
  div = jnp.exp(jnp.arange(0, d_model, 2, dtype=jnp.float32)
                * (-math.log(10000.0) / d_model))
  pe = jnp.zeros((max_len, d_model), jnp.float32)
  pe = pe.at[:, 0::2].set(jnp.sin(pos * div))
  pe = pe.at[:, 1::2].set(jnp.cos(pos * div))
  return pe


def prep_params(params, *, batch, seq, n_heads, weight_dtype=jnp.bfloat16):
  """One-time prep: fold LN affines / attention scale, transpose weights to
  bf16, pack the tiny bias/LN columns, stack per-layer tensors."""
  w_in = params['w_in']                          # [din, D]
  D = w_in.shape[1]
  dout = params['w_out'].shape[1]
  layers = params['layers']
  dff = layers[0]['w_ff1'].shape[1]
  scale = 1.0 / math.sqrt(D // n_heads)

  pe = make_pe(5000, D)[:seq]                    # [S, D]

  # Fold ln_in affine into linear_in and ln_f affine into linear_out.
  w_inT = w_in.T * params['ln_in_g'][None, :]
  b_in = w_in.T @ params['ln_in_b'] + params['b_in']
  w_outT = params['w_out'].T * params['ln_f_g'][None, :]
  b_out = params['w_out'].T @ params['ln_f_b'] + params['b_out']

  stem_cols = _pack_cols(
      dict(b_in=b_in, ln_in2_g=params['ln_in2_g'], ln_in2_b=params['ln_in2_b'],
           b_out=b_out, ln_out_g=params['ln_out_g'],
           ln_out_b=params['ln_out_b']),
      _stem_col_layout(D, dout))

  w_qkvT, w_oT, w_ff1T, w_ff2T, layer_cols = [], [], [], [], []
  for lp in layers:
    # Fold the attention 1/sqrt(head_dim) scale into the Q rows.
    wq = lp['w_qkv'].T.at[:D].multiply(scale)    # [3D, D]
    bq = lp['b_qkv'].at[:D].multiply(scale)
    w_qkvT.append(wq)
    w_oT.append(lp['w_o'].T)
    w_ff1T.append(lp['w_ff1'].T)
    w_ff2T.append(lp['w_ff2'].T)
    layer_cols.append(_pack_cols(
        dict(b_qkv=bq, b_o=lp['b_o'], ln1_g=lp['ln1_g'], ln1_b=lp['ln1_b'],
             b_ff1=lp['b_ff1'], b_ff2=lp['b_ff2'],
             ln2_g=lp['ln2_g'], ln2_b=lp['ln2_b']),
        _layer_col_layout(D, dff)))

  wd = weight_dtype
  return dict(
      pe=jnp.tile(pe.T, (1, batch)).astype(jnp.float32),   # [D, B*S]
      w_inT=w_inT.astype(wd),
      w_qkvT=jnp.stack(w_qkvT).astype(wd),
      w_oT=jnp.stack(w_oT).astype(wd),
      w_ff1T=jnp.stack(w_ff1T).astype(wd),
      w_ff2T=jnp.stack(w_ff2T).astype(wd),
      w_outT=w_outT.astype(wd),
      stem_cols=stem_cols,
      layer_cols=jnp.stack(layer_cols),
  )


# --------------------------------- forward -----------------------------------

def bottleneck_forward(x, kp, *, patch_size, n_heads):
  B, C, H, W = x.shape
  p = patch_size
  hh, ww = H // p, W // p
  S = hh * ww
  N = B * S
  din = p * p * C
  dout = kp['w_outT'].shape[0]

  # 'b c (h p1) (w p2) -> (p1 p2 c) (b h w)' — token axis last (lane-dense).
  xT = (x.reshape(B, C, hh, p, ww, p)
         .transpose(3, 5, 1, 0, 2, 4)
         .reshape(din, N))

  kernel = functools.partial(_bottleneck_kernel, n_heads=n_heads, batch=B,
                             eps=1e-5)
  # Gridless single invocation: whole working set (< 1 MiB) is VMEM-resident.
  # TODO(synk): for larger real workloads add a leading "parallel" grid axis
  # over image chunks so both v7x TensorCores are used.
  outT = pl.pallas_call(
      kernel,
      out_shape=jax.ShapeDtypeStruct((dout, N), x.dtype),
  )(xT, kp['pe'], kp['w_inT'], kp['w_qkvT'], kp['w_oT'], kp['w_ff1T'],
    kp['w_ff2T'], kp['w_outT'], kp['stem_cols'], kp['layer_cols'])

  Cout = dout // (p * p)
  # '(p1 p2 c) (b h w) -> b c (h p1) (w p2)'
  y = (outT.reshape(p, p, Cout, B, hh, ww)
           .transpose(3, 2, 4, 0, 5, 1)
           .reshape(B, Cout, H, W))
  return y


# ------------------------- plain-JAX reference (check) -----------------------

def bottleneck_reference(x, params, *, patch_size, n_heads):
  HIGH = jax.lax.Precision.HIGHEST

  def mm(a, b):
    return jnp.einsum('...ij,jk->...ik', a, b, precision=HIGH)

  B, C, H, W = x.shape
  p = patch_size
  hh, ww = H // p, W // p
  S = hh * ww
  t = (x.reshape(B, C, hh, p, ww, p).transpose(0, 2, 4, 3, 5, 1)
        .reshape(B, S, p * p * C))

  def ln(v, g, b, eps=1e-5):
    mu = v.mean(-1, keepdims=True)
    var = ((v - mu) ** 2).mean(-1, keepdims=True)
    return (v - mu) * jax.lax.rsqrt(var + eps) * g + b

  h = ln(t, params['ln_in_g'], params['ln_in_b'])
  h = mm(h, params['w_in']) + params['b_in']
  h = ln(h, params['ln_in2_g'], params['ln_in2_b'])
  D = h.shape[-1]
  h = h + make_pe(5000, D)[:S][None]

  hd = D // n_heads
  scale = 1.0 / math.sqrt(hd)
  for lp in params['layers']:
    qkv = mm(h, lp['w_qkv']) + lp['b_qkv']
    q, k, v = jnp.split(qkv, 3, axis=-1)
    qh = q.reshape(B, S, n_heads, hd) * scale
    kh = k.reshape(B, S, n_heads, hd)
    vh = v.reshape(B, S, n_heads, hd)
    # attention over the batch axis (batch_first=False quirk)
    sc = jnp.einsum('bshd,cshd->shbc', qh, kh, precision=HIGH)
    pp = jax.nn.softmax(sc, axis=-1)
    oh = jnp.einsum('shbc,cshd->bshd', pp, vh, precision=HIGH).reshape(B, S, D)
    attn = mm(oh, lp['w_o']) + lp['b_o']
    h = ln(h + attn, lp['ln1_g'], lp['ln1_b'])
    ff = mm(jax.nn.relu(mm(h, lp['w_ff1']) + lp['b_ff1']),
            lp['w_ff2']) + lp['b_ff2']
    h = ln(h + ff, lp['ln2_g'], lp['ln2_b'])

  h = ln(h, params['ln_f_g'], params['ln_f_b'])
  out = mm(h, params['w_out']) + params['b_out']
  out = ln(out, params['ln_out_g'], params['ln_out_b'])
  Cout = out.shape[-1] // (p * p)
  return (out.reshape(B, hh, ww, p, p, Cout).transpose(0, 5, 1, 3, 2, 4)
             .reshape(B, Cout, H, W))


# ----------------------------------- main -------------------------------------

if __name__ == "__main__":
  feat_in = feat_out = 4
  patch_size = 2
  d_model = 32
  n_heads = 4
  ff_expansion = 2
  n_layers = 2
  B, H, W = 2, 16, 16

  key = jax.random.PRNGKey(0)
  kx, kw = jax.random.split(key)
  x = jax.random.normal(kx, (B, feat_in, H, W), jnp.float32)
  params = init_params(kw, feat_in, feat_out, n_layers, d_model, n_heads,
                       ff_expansion, patch_size)
  S = (H // patch_size) * (W // patch_size)
  kparams = prep_params(params, batch=B, seq=S, n_heads=n_heads)

  fwd = jax.jit(functools.partial(bottleneck_forward, patch_size=patch_size,
                                  n_heads=n_heads))
  y = fwd(x, kparams)
  jax.block_until_ready(y)

  y_ref = bottleneck_reference(x, params, patch_size=patch_size,
                               n_heads=n_heads)
  assert y.shape == (B, feat_out, H, W), y.shape
  assert bool(jnp.all(jnp.isfinite(y)))
  # Kernel uses single-pass bf16 MXU matmuls + approx softmax reciprocal;
  # reference is full-f32 HIGHEST precision, so tolerance is bf16-level.
  err = float(jnp.max(jnp.abs(y - y_ref)))
  assert bool(jnp.allclose(y, y_ref, atol=3e-2, rtol=3e-2)), err
  print("KERNEL_OK")
</pallas_src>

<mosaic_0001>
module attributes {stable_mosaic.version = 11 : i64} {
  func.func @_bottleneck_kernel(%arg0: memref<16x128xf32, #tpu.memory_space<vmem>>, %arg1: memref<32x128xf32, #tpu.memory_space<vmem>>, %arg2: memref<32x16xbf16, #tpu.memory_space<vmem>>, %arg3: memref<2x96x32xbf16, #tpu.memory_space<vmem>>, %arg4: memref<2x32x32xbf16, #tpu.memory_space<vmem>>, %arg5: memref<2x64x32xbf16, #tpu.memory_space<vmem>>, %arg6: memref<2x32x64xbf16, #tpu.memory_space<vmem>>, %arg7: memref<16x32xbf16, #tpu.memory_space<vmem>>, %arg8: memref<144x1xf32, #tpu.memory_space<vmem>>, %arg9: memref<2x352x1xf32, #tpu.memory_space<vmem>>, %arg10: memref<16x128xf32, #tpu.memory_space<vmem>>) attributes {dimension_semantics = [], scalar_prefetch = 0 : i64, scratch_operands = 0 : i64, tpu.core_type = #tpu.core_type<tc>} {
    %c0 = arith.constant 0 : index
    %c0_0 = arith.constant 0 : index
    %0 = vector.load %arg8[%c0, %c0_0] : memref<144x1xf32, #tpu.memory_space<vmem>>, vector<144x1xf32>
    %1 = vector.extract_strided_slice %0 {offsets = [0, 0], sizes = [32, 1], strides = [1, 1]} : vector<144x1xf32> to vector<32x1xf32>
    %2 = vector.extract_strided_slice %0 {offsets = [32, 0], sizes = [32, 1], strides = [1, 1]} : vector<144x1xf32> to vector<32x1xf32>
    %3 = vector.extract_strided_slice %0 {offsets = [64, 0], sizes = [32, 1], strides = [1, 1]} : vector<144x1xf32> to vector<32x1xf32>
    %4 = vector.extract_strided_slice %0 {offsets = [96, 0], sizes = [16, 1], strides = [1, 1]} : vector<144x1xf32> to vector<16x1xf32>
    %5 = vector.extract_strided_slice %0 {offsets = [112, 0], sizes = [16, 1], strides = [1, 1]} : vector<144x1xf32> to vector<16x1xf32>
    %6 = vector.extract_strided_slice %0 {offsets = [128, 0], sizes = [16, 1], strides = [1, 1]} : vector<144x1xf32> to vector<16x1xf32>
    %c0_1 = arith.constant 0 : index
    %c0_2 = arith.constant 0 : index
    %7 = vector.load %arg2[%c0_1, %c0_2] : memref<32x16xbf16, #tpu.memory_space<vmem>>, vector<32x16xbf16>
    %c0_3 = arith.constant 0 : index
    %c0_4 = arith.constant 0 : index
    %8 = vector.load %arg0[%c0_3, %c0_4] : memref<16x128xf32, #tpu.memory_space<vmem>>, vector<16x128xf32>
    %cst = arith.constant dense<0.000000e+00> : vector<128xf32>
    %9 = vector.multi_reduction <add>, %8, %cst [0] : vector<16x128xf32> to vector<128xf32>
    %10 = vector.shape_cast %9 : vector<128xf32> to vector<1x128xf32>
    %cst_5 = arith.constant 1.600000e+01 : f32
    %11 = vector.broadcast %cst_5 : f32 to vector<1x128xf32>
    %12 = arith.divf %10, %11 : vector<1x128xf32>
    %13 = arith.mulf %8, %8 : vector<16x128xf32>
    %cst_6 = arith.constant dense<0.000000e+00> : vector<128xf32>
    %14 = vector.multi_reduction <add>, %13, %cst_6 [0] : vector<16x128xf32> to vector<128xf32>
    %15 = vector.shape_cast %14 : vector<128xf32> to vector<1x128xf32>
    %cst_7 = arith.constant 1.600000e+01 : f32
    %16 = vector.broadcast %cst_7 : f32 to vector<1x128xf32>
    %17 = arith.divf %15, %16 : vector<1x128xf32>
    %18 = vector.broadcast %12 : vector<1x128xf32> to vector<16x128xf32>
    %19 = arith.subf %8, %18 : vector<16x128xf32>
    %20 = arith.mulf %12, %12 : vector<1x128xf32>
    %21 = arith.subf %17, %20 : vector<1x128xf32>
    %cst_8 = arith.constant 9.99999974E-6 : f32
    %22 = vector.broadcast %cst_8 : f32 to vector<1x128xf32>
    %23 = arith.addf %21, %22 : vector<1x128xf32>
    %24 = math.rsqrt %23 : vector<1x128xf32>
    %25 = vector.broadcast %24 : vector<1x128xf32> to vector<16x128xf32>
    %26 = arith.mulf %19, %25 : vector<16x128xf32>
    %27 = arith.truncf %26 : vector<16x128xf32> to vector<16x128xbf16>
    %cst_9 = arith.constant dense<0.000000e+00> : vector<32x128xf32>
    %28 = tpu.matmul %7, %27, %cst_9 {dimension_numbers = #tpu.dot_dimension_numbers<[1], [0], [0], [1], [0, 0, 1, 1], [], []>} : vector<32x16xbf16>, vector<16x128xbf16>, vector<32x128xf32> -> vector<32x128xf32>
    %29 = vector.broadcast %1 : vector<32x1xf32> to vector<32x128xf32>
    %30 = arith.addf %28, %29 : vector<32x128xf32>
    %cst_10 = arith.constant dense<0.000000e+00> : vector<128xf32>
    %31 = vector.multi_reduction <add>, %30, %cst_10 [0] : vector<32x128xf32> to vector<128xf32>
    %32 = vector.shape_cast %31 : vector<128xf32> to vector<1x128xf32>
    %cst_11 = arith.constant 3.200000e+01 : f32
    %33 = vector.broadcast %cst_11 : f32 to vector<1x128xf32>
    %34 = arith.divf %32, %33 : vector<1x128xf32>
    %35 = arith.mulf %30, %30 : vector<32x128xf32>
    %cst_12 = arith.constant dense<0.000000e+00> : vector<128xf32>
    %36 = vector.multi_reduction <add>, %35, %cst_12 [0] : vector<32x128xf32> to vector<128xf32>
    %37 = vector.shape_cast %36 : vector<128xf32> to vector<1x128xf32>
    %cst_13 = arith.constant 3.200000e+01 : f32
    %38 = vector.broadcast %cst_13 : f32 to vector<1x128xf32>
    %39 = arith.divf %37, %38 : vector<1x128xf32>
    %40 = vector.broadcast %34 : vector<1x128xf32> to vector<32x128xf32>
    %41 = arith.subf %30, %40 : vector<32x128xf32>
    %42 = arith.mulf %34, %34 : vector<1x128xf32>
    %43 = arith.subf %39, %42 : vector<1x128xf32>
    %cst_14 = arith.constant 9.99999974E-6 : f32
    %44 = vector.broadcast %cst_14 : f32 to vector<1x128xf32>
    %45 = arith.addf %43, %44 : vector<1x128xf32>
    %46 = math.rsqrt %45 : vector<1x128xf32>
    %47 = vector.broadcast %46 : vector<1x128xf32> to vector<32x128xf32>
    %48 = arith.mulf %41, %47 : vector<32x128xf32>
    %49 = vector.broadcast %2 : vector<32x1xf32> to vector<32x128xf32>
    %50 = arith.mulf %48, %49 : vector<32x128xf32>
    %51 = vector.broadcast %3 : vector<32x1xf32> to vector<32x128xf32>
    %52 = arith.addf %50, %51 : vector<32x128xf32>
    %c0_15 = arith.constant 0 : index
    %c0_16 = arith.constant 0 : index
    %53 = vector.load %arg1[%c0_15, %c0_16] : memref<32x128xf32, #tpu.memory_space<vmem>>, vector<32x128xf32>
    %54 = arith.addf %52, %53 : vector<32x128xf32>
    %c0_17 = arith.constant 0 : index
    %c0_18 = arith.constant 0 : index
    %c0_19 = arith.constant 0 : index
    %55 = vector.load %arg9[%c0_17, %c0_18, %c0_19] : memref<2x352x1xf32, #tpu.memory_space<vmem>>, vector<1x352x1xf32>
    %56 = vector.shape_cast %55 : vector<1x352x1xf32> to vector<352x1xf32>
    %57 = vector.extract_strided_slice %56 {offsets = [0, 0], sizes = [96, 1], strides = [1, 1]} : vector<352x1xf32> to vector<96x1xf32>
    %58 = vector.extract_strided_slice %56 {offsets = [96, 0], sizes = [32, 1], strides = [1, 1]} : vector<352x1xf32> to vector<32x1xf32>
    %59 = vector.extract_strided_slice %56 {offsets = [128, 0], sizes = [32, 1], strides = [1, 1]} : vector<352x1xf32> to vector<32x1xf32>
    %60 = vector.extract_strided_slice %56 {offsets = [160, 0], sizes = [32, 1], strides = [1, 1]} : vector<352x1xf32> to vector<32x1xf32>
    %61 = vector.extract_strided_slice %56 {offsets = [192, 0], sizes = [64, 1], strides = [1, 1]} : vector<352x1xf32> to vector<64x1xf32>
    %62 = vector.extract_strided_slice %56 {offsets = [256, 0], sizes = [32, 1], strides = [1, 1]} : vector<352x1xf32> to vector<32x1xf32>
    %63 = vector.extract_strided_slice %56 {offsets = [288, 0], sizes = [32, 1], strides = [1, 1]} : vector<352x1xf32> to vector<32x1xf32>
    %64 = vector.extract_strided_slice %56 {offsets = [320, 0], sizes = [32, 1], strides = [1, 1]} : vector<352x1xf32> to vector<32x1xf32>
    %c0_20 = arith.constant 0 : index
    %c0_21 = arith.constant 0 : index
    %c0_22 = arith.constant 0 : index
    %65 = vector.load %arg3[%c0_20, %c0_21, %c0_22] : memref<2x96x32xbf16, #tpu.memory_space<vmem>>, vector<1x96x32xbf16>
    %66 = vector.shape_cast %65 : vector<1x96x32xbf16> to vector<96x32xbf16>
    %67 = arith.truncf %54 : vector<32x128xf32> to vector<32x128xbf16>
    %cst_23 = arith.constant dense<0.000000e+00> : vector<96x128xf32>
    %68 = tpu.matmul %66, %67, %cst_23 {dimension_numbers = #tpu.dot_dimension_numbers<[1], [0], [0], [1], [0, 0, 1, 1], [], []>} : vector<96x32xbf16>, vector<32x128xbf16>, vector<96x128xf32> -> vector<96x128xf32>
    %69 = vector.broadcast %57 : vector<96x1xf32> to vector<96x128xf32>
    %70 = arith.addf %68, %69 : vector<96x128xf32>
    %71 = vector.extract_strided_slice %70 {offsets = [0, 0], sizes = [32, 128], strides = [1, 1]} : vector<96x128xf32> to vector<32x128xf32>
    %72 = vector.extract_strided_slice %70 {offsets = [32, 0], sizes = [32, 128], strides = [1, 1]} : vector<96x128xf32> to vector<32x128xf32>
    %73 = vector.extract_strided_slice %70 {offsets = [64, 0], sizes = [32, 128], strides = [1, 1]} : vector<96x128xf32> to vector<32x128xf32>
    %74 = vector.shape_cast %73 : vector<32x128xf32> to vector<4x8x128xf32>
    %75 = arith.mulf %71, %72 : vector<32x128xf32>
    %76 = vector.shape_cast %75 : vector<32x128xf32> to vector<4x8x128xf32>
    %cst_24 = arith.constant dense<0.000000e+00> : vector<4x128xf32>
    %77 = vector.multi_reduction <add>, %76, %cst_24 [1] : vector<4x8x128xf32> to vector<4x128xf32>
    %c64_i32 = arith.constant 64 : i32
    %78 = tpu.dynamic_rotate %72 by %c64_i32 dim 1 : vector<32x128xf32>, i32 -> vector<32x128xf32>
    %c64_i32_25 = arith.constant 64 : i32
    %79 = tpu.dynamic_rotate %73 by %c64_i32_25 dim 1 : vector<32x128xf32>, i32 -> vector<32x128xf32>
    %80 = vector.shape_cast %79 : vector<32x128xf32> to vector<4x8x128xf32>
    %81 = arith.mulf %71, %78 : vector<32x128xf32>
    %82 = vector.shape_cast %81 : vector<32x128xf32> to vector<4x8x128xf32>
    %cst_26 = arith.constant dense<0.000000e+00> : vector<4x128xf32>
    %83 = vector.multi_reduction <add>, %82, %cst_26 [1] : vector<4x8x128xf32> to vector<4x128xf32>
    %84 = arith.maximumf %77, %83 : vector<4x128xf32>
    %85 = arith.subf %77, %84 : vector<4x128xf32>
    %86 = math.exp %85 : vector<4x128xf32>
    %87 = arith.subf %83, %84 : vector<4x128xf32>
    %88 = math.exp %87 : vector<4x128xf32>
    %89 = arith.addf %86, %88 : vector<4x128xf32>
    %90 = tpu.reciprocal %89 {approx = true} : vector<4x128xf32> -> vector<4x128xf32>
    %91 = vector.shape_cast %86 : vector<4x128xf32> to vector<4x1x128xf32>
    %92 = vector.broadcast %91 : vector<4x1x128xf32> to vector<4x8x128xf32>
    %93 = arith.mulf %92, %74 : vector<4x8x128xf32>
    %94 = vector.shape_cast %88 : vector<4x128xf32> to vector<4x1x128xf32>
    %95 = vector.broadcast %94 : vector<4x1x128xf32> to vector<4x8x128xf32>
    %96 = arith.mulf %95, %80 : vector<4x8x128xf32>
    %97 = arith.addf %93, %96 : vector<4x8x128xf32>
    %98 = vector.shape_cast %90 : vector<4x128xf32> to vector<4x1x128xf32>
    %99 = vector.broadcast %98 : vector<4x1x128xf32> to vector<4x8x128xf32>
    %100 = arith.mulf %97, %99 : vector<4x8x128xf32>
    %101 = vector.shape_cast %100 : vector<4x8x128xf32> to vector<32x128xf32>
    %c0_27 = arith.constant 0 : index
    %c0_28 = arith.constant 0 : index
    %c0_29 = arith.constant 0 : index
    %102 = vector.load %arg4[%c0_27, %c0_28, %c0_29] : memref<2x32x32xbf16, #tpu.memory_space<vmem>>, vector<1x32x32xbf16>
    %103 = vector.shape_cast %102 : vector<1x32x32xbf16> to vector<32x32xbf16>
    %104 = arith.truncf %101 : vector<32x128xf32> to vector<32x128xbf16>
    %cst_30 = arith.constant dense<0.000000e+00> : vector<32x128xf32>
    %105 = tpu.matmul %103, %104, %cst_30 {dimension_numbers = #tpu.dot_dimension_numbers<[1], [0], [0], [1], [0, 0, 1, 1], [], []>} : vector<32x32xbf16>, vector<32x128xbf16>, vector<32x128xf32> -> vector<32x128xf32>
    %106 = vector.broadcast %58 : vector<32x1xf32> to vector<32x128xf32>
    %107 = arith.addf %105, %106 : vector<32x128xf32>
    %108 = arith.addf %54, %107 : vector<32x128xf32>
    %cst_31 = arith.constant dense<0.000000e+00> : vector<128xf32>
    %109 = vector.multi_reduction <add>, %108, %cst_31 [0] : vector<32x128xf32> to vector<128xf32>
    %110 = vector.shape_cast %109 : vector<128xf32> to vector<1x128xf32>
    %cst_32 = arith.constant 3.200000e+01 : f32
    %111 = vector.broadcast %cst_32 : f32 to vector<1x128xf32>
    %112 = arith.divf %110, %111 : vector<1x128xf32>
    %113 = arith.mulf %108, %108 : vector<32x128xf32>
    %cst_33 = arith.constant dense<0.000000e+00> : vector<128xf32>
    %114 = vector.multi_reduction <add>, %113, %cst_33 [0] : vector<32x128xf32> to vector<128xf32>
    %115 = vector.shape_cast %114 : vector<128xf32> to vector<1x128xf32>
    %cst_34 = arith.constant 3.200000e+01 : f32
    %116 = vector.broadcast %cst_34 : f32 to vector<1x128xf32>
    %117 = arith.divf %115, %116 : vector<1x128xf32>
    %118 = vector.broadcast %112 : vector<1x128xf32> to vector<32x128xf32>
    %119 = arith.subf %108, %118 : vector<32x128xf32>
    %120 = arith.mulf %112, %112 : vector<1x128xf32>
    %121 = arith.subf %117, %120 : vector<1x128xf32>
    %cst_35 = arith.constant 9.99999974E-6 : f32
    %122 = vector.broadcast %cst_35 : f32 to vector<1x128xf32>
    %123 = arith.addf %121, %122 : vector<1x128xf32>
    %124 = math.rsqrt %123 : vector<1x128xf32>
    %125 = vector.broadcast %124 : vector<1x128xf32> to vector<32x128xf32>
    %126 = arith.mulf %119, %125 : vector<32x128xf32>
    %127 = vector.broadcast %59 : vector<32x1xf32> to vector<32x128xf32>
    %128 = arith.mulf %126, %127 : vector<32x128xf32>
    %129 = vector.broadcast %60 : vector<32x1xf32> to vector<32x128xf32>
    %130 = arith.addf %128, %129 : vector<32x128xf32>
    %c0_36 = arith.constant 0 : index
    %c0_37 = arith.constant 0 : index
    %c0_38 = arith.constant 0 : index
    %131 = vector.load %arg5[%c0_36, %c0_37, %c0_38] : memref<2x64x32xbf16, #tpu.memory_space<vmem>>, vector<1x64x32xbf16>
    %132 = vector.shape_cast %131 : vector<1x64x32xbf16> to vector<64x32xbf16>
    %133 = arith.truncf %130 : vector<32x128xf32> to vector<32x128xbf16>
    %cst_39 = arith.constant dense<0.000000e+00> : vector<64x128xf32>
    %134 = tpu.matmul %132, %133, %cst_39 {dimension_numbers = #tpu.dot_dimension_numbers<[1], [0], [0], [1], [0, 0, 1, 1], [], []>} : vector<64x32xbf16>, vector<32x128xbf16>, vector<64x128xf32> -> vector<64x128xf32>
    %135 = vector.broadcast %61 : vector<64x1xf32> to vector<64x128xf32>
    %136 = arith.addf %134, %135 : vector<64x128xf32>
    %cst_40 = arith.constant 0.000000e+00 : f32
    %137 = vector.broadcast %cst_40 : f32 to vector<64x128xf32>
    %138 = arith.maximumf %136, %137 : vector<64x128xf32>
    %c0_41 = arith.constant 0 : index
    %c0_42 = arith.constant 0 : index
    %c0_43 = arith.constant 0 : index
    %139 = vector.load %arg6[%c0_41, %c0_42, %c0_43] : memref<2x32x64xbf16, #tpu.memory_space<vmem>>, vector<1x32x64xbf16>
    %140 = vector.shape_cast %139 : vector<1x32x64xbf16> to vector<32x64xbf16>
    %141 = arith.truncf %138 : vector<64x128xf32> to vector<64x128xbf16>
    %cst_44 = arith.constant dense<0.000000e+00> : vector<32x128xf32>
    %142 = tpu.matmul %140, %141, %cst_44 {dimension_numbers = #tpu.dot_dimension_numbers<[1], [0], [0], [1], [0, 0, 1, 1], [], []>} : vector<32x64xbf16>, vector<64x128xbf16>, vector<32x128xf32> -> vector<32x128xf32>
    %143 = vector.broadcast %62 : vector<32x1xf32> to vector<32x128xf32>
    %144 = arith.addf %142, %143 : vector<32x128xf32>
    %145 = arith.addf %130, %144 : vector<32x128xf32>
    %cst_45 = arith.constant dense<0.000000e+00> : vector<128xf32>
    %146 = vector.multi_reduction <add>, %145, %cst_45 [0] : vector<32x128xf32> to vector<128xf32>
    %147 = vector.shape_cast %146 : vector<128xf32> to vector<1x128xf32>
    %cst_46 = arith.constant 3.200000e+01 : f32
    %148 = vector.broadcast %cst_46 : f32 to vector<1x128xf32>
    %149 = arith.divf %147, %148 : vector<1x128xf32>
    %150 = arith.mulf %145, %145 : vector<32x128xf32>
    %cst_47 = arith.constant dense<0.000000e+00> : vector<128xf32>
    %151 = vector.multi_reduction <add>, %150, %cst_47 [0] : vector<32x128xf32> to vector<128xf32>
    %152 = vector.shape_cast %151 : vector<128xf32> to vector<1x128xf32>
    %cst_48 = arith.constant 3.200000e+01 : f32
    %153 = vector.broadcast %cst_48 : f32 to vector<1x128xf32>
    %154 = arith.divf %152, %153 : vector<1x128xf32>
    %155 = vector.broadcast %149 : vector<1x128xf32> to vector<32x128xf32>
    %156 = arith.subf %145, %155 : vector<32x128xf32>
    %157 = arith.mulf %149, %149 : vector<1x128xf32>
    %158 = arith.subf %154, %157 : vector<1x128xf32>
    %cst_49 = arith.constant 9.99999974E-6 : f32
    %159 = vector.broadcast %cst_49 : f32 to vector<1x128xf32>
    %160 = arith.addf %158, %159 : vector<1x128xf32>
    %161 = math.rsqrt %160 : vector<1x128xf32>
    %162 = vector.broadcast %161 : vector<1x128xf32> to vector<32x128xf32>
    %163 = arith.mulf %156, %162 : vector<32x128xf32>
    %164 = vector.broadcast %63 : vector<32x1xf32> to vector<32x128xf32>
    %165 = arith.mulf %163, %164 : vector<32x128xf32>
    %166 = vector.broadcast %64 : vector<32x1xf32> to vector<32x128xf32>
    %167 = arith.addf %165, %166 : vector<32x128xf32>
    %c1 = arith.constant 1 : index
    %c0_50 = arith.constant 0 : index
    %c0_51 = arith.constant 0 : index
    %168 = vector.load %arg9[%c1, %c0_50, %c0_51] : memref<2x352x1xf32, #tpu.memory_space<vmem>>, vector<1x352x1xf32>
    %169 = vector.shape_cast %168 : vector<1x352x1xf32> to vector<352x1xf32>
    %170 = vector.extract_strided_slice %169 {offsets = [0, 0], sizes = [96, 1], strides = [1, 1]} : vector<352x1xf32> to vector<96x1xf32>
    %171 = vector.extract_strided_slice %169 {offsets = [96, 0], sizes = [32, 1], strides = [1, 1]} : vector<352x1xf32> to vector<32x1xf32>
    %172 = vector.extract_strided_slice %169 {offsets = [128, 0], sizes = [32, 1], strides = [1, 1]} : vector<352x1xf32> to vector<32x1xf32>
    %173 = vector.extract_strided_slice %169 {offsets = [160, 0], sizes = [32, 1], strides = [1, 1]} : vector<352x1xf32> to vector<32x1xf32>
    %174 = vector.extract_strided_slice %169 {offsets = [192, 0], sizes = [64, 1], strides = [1, 1]} : vector<352x1xf32> to vector<64x1xf32>
    %175 = vector.extract_strided_slice %169 {offsets = [256, 0], sizes = [32, 1], strides = [1, 1]} : vector<352x1xf32> to vector<32x1xf32>
    %176 = vector.extract_strided_slice %169 {offsets = [288, 0], sizes = [32, 1], strides = [1, 1]} : vector<352x1xf32> to vector<32x1xf32>
    %177 = vector.extract_strided_slice %169 {offsets = [320, 0], sizes = [32, 1], strides = [1, 1]} : vector<352x1xf32> to vector<32x1xf32>
    %c1_52 = arith.constant 1 : index
    %c0_53 = arith.constant 0 : index
    %c0_54 = arith.constant 0 : index
    %178 = vector.load %arg3[%c1_52, %c0_53, %c0_54] : memref<2x96x32xbf16, #tpu.memory_space<vmem>>, vector<1x96x32xbf16>
    %179 = vector.shape_cast %178 : vector<1x96x32xbf16> to vector<96x32xbf16>
    %180 = arith.truncf %167 : vector<32x128xf32> to vector<32x128xbf16>
    %cst_55 = arith.constant dense<0.000000e+00> : vector<96x128xf32>
    %181 = tpu.matmul %179, %180, %cst_55 {dimension_numbers = #tpu.dot_dimension_numbers<[1], [0], [0], [1], [0, 0, 1, 1], [], []>} : vector<96x32xbf16>, vector<32x128xbf16>, vector<96x128xf32> -> vector<96x128xf32>
    %182 = vector.broadcast %170 : vector<96x1xf32> to vector<96x128xf32>
    %183 = arith.addf %181, %182 : vector<96x128xf32>
    %184 = vector.extract_strided_slice %183 {offsets = [0, 0], sizes = [32, 128], strides = [1, 1]} : vector<96x128xf32> to vector<32x128xf32>
    %185 = vector.extract_strided_slice %183 {offsets = [32, 0], sizes = [32, 128], strides = [1, 1]} : vector<96x128xf32> to vector<32x128xf32>
    %186 = vector.extract_strided_slice %183 {offsets = [64, 0], sizes = [32, 128], strides = [1, 1]} : vector<96x128xf32> to vector<32x128xf32>
    %187 = vector.shape_cast %186 : vector<32x128xf32> to vector<4x8x128xf32>
    %188 = arith.mulf %184, %185 : vector<32x128xf32>
    %189 = vector.shape_cast %188 : vector<32x128xf32> to vector<4x8x128xf32>
    %cst_56 = arith.constant dense<0.000000e+00> : vector<4x128xf32>
    %190 = vector.multi_reduction <add>, %189, %cst_56 [1] : vector<4x8x128xf32> to vector<4x128xf32>
    %c64_i32_57 = arith.constant 64 : i32
    %191 = tpu.dynamic_rotate %185 by %c64_i32_57 dim 1 : vector<32x128xf32>, i32 -> vector<32x128xf32>
    %c64_i32_58 = arith.constant 64 : i32
    %192 = tpu.dynamic_rotate %186 by %c64_i32_58 dim 1 : vector<32x128xf32>, i32 -> vector<32x128xf32>
    %193 = vector.shape_cast %192 : vector<32x128xf32> to vector<4x8x128xf32>
    %194 = arith.mulf %184, %191 : vector<32x128xf32>
    %195 = vector.shape_cast %194 : vector<32x128xf32> to vector<4x8x128xf32>
    %cst_59 = arith.constant dense<0.000000e+00> : vector<4x128xf32>
    %196 = vector.multi_reduction <add>, %195, %cst_59 [1] : vector<4x8x128xf32> to vector<4x128xf32>
    %197 = arith.maximumf %190, %196 : vector<4x128xf32>
    %198 = arith.subf %190, %197 : vector<4x128xf32>
    %199 = math.exp %198 : vector<4x128xf32>
    %200 = arith.subf %196, %197 : vector<4x128xf32>
    %201 = math.exp %200 : vector<4x128xf32>
    %202 = arith.addf %199, %201 : vector<4x128xf32>
    %203 = tpu.reciprocal %202 {approx = true} : vector<4x128xf32> -> vector<4x128xf32>
    %204 = vector.shape_cast %199 : vector<4x128xf32> to vector<4x1x128xf32>
    %205 = vector.broadcast %204 : vector<4x1x128xf32> to vector<4x8x128xf32>
    %206 = arith.mulf %205, %187 : vector<4x8x128xf32>
    %207 = vector.shape_cast %201 : vector<4x128xf32> to vector<4x1x128xf32>
    %208 = vector.broadcast %207 : vector<4x1x128xf32> to vector<4x8x128xf32>
    %209 = arith.mulf %208, %193 : vector<4x8x128xf32>
    %210 = arith.addf %206, %209 : vector<4x8x128xf32>
    %211 = vector.shape_cast %203 : vector<4x128xf32> to vector<4x1x128xf32>
    %212 = vector.broadcast %211 : vector<4x1x128xf32> to vector<4x8x128xf32>
    %213 = arith.mulf %210, %212 : vector<4x8x128xf32>
    %214 = vector.shape_cast %213 : vector<4x8x128xf32> to vector<32x128xf32>
    %c1_60 = arith.constant 1 : index
    %c0_61 = arith.constant 0 : index
    %c0_62 = arith.constant 0 : index
    %215 = vector.load %arg4[%c1_60, %c0_61, %c0_62] : memref<2x32x32xbf16, #tpu.memory_space<vmem>>, vector<1x32x32xbf16>
    %216 = vector.shape_cast %215 : vector<1x32x32xbf16> to vector<32x32xbf16>
    %217 = arith.truncf %214 : vector<32x128xf32> to vector<32x128xbf16>
    %cst_63 = arith.constant dense<0.000000e+00> : vector<32x128xf32>
    %218 = tpu.matmul %216, %217, %cst_63 {dimension_numbers = #tpu.dot_dimension_numbers<[1], [0], [0], [1], [0, 0, 1, 1], [], []>} : vector<32x32xbf16>, vector<32x128xbf16>, vector<32x128xf32> -> vector<32x128xf32>
    %219 = vector.broadcast %171 : vector<32x1xf32> to vector<32x128xf32>
    %220 = arith.addf %218, %219 : vector<32x128xf32>
    %221 = arith.addf %167, %220 : vector<32x128xf32>
    %cst_64 = arith.constant dense<0.000000e+00> : vector<128xf32>
    %222 = vector.multi_reduction <add>, %221, %cst_64 [0] : vector<32x128xf32> to vector<128xf32>
    %223 = vector.shape_cast %222 : vector<128xf32> to vector<1x128xf32>
    %cst_65 = arith.constant 3.200000e+01 : f32
    %224 = vector.broadcast %cst_65 : f32 to vector<1x128xf32>
    %225 = arith.divf %223, %224 : vector<1x128xf32>
    %226 = arith.mulf %221, %221 : vector<32x128xf32>
    %cst_66 = arith.constant dense<0.000000e+00> : vector<128xf32>
    %227 = vector.multi_reduction <add>, %226, %cst_66 [0] : vector<32x128xf32> to vector<128xf32>
    %228 = vector.shape_cast %227 : vector<128xf32> to vector<1x128xf32>
    %cst_67 = arith.constant 3.200000e+01 : f32
    %229 = vector.broadcast %cst_67 : f32 to vector<1x128xf32>
    %230 = arith.divf %228, %229 : vector<1x128xf32>
    %231 = vector.broadcast %225 : vector<1x128xf32> to vector<32x128xf32>
    %232 = arith.subf %221, %231 : vector<32x128xf32>
    %233 = arith.mulf %225, %225 : vector<1x128xf32>
    %234 = arith.subf %230, %233 : vector<1x128xf32>
    %cst_68 = arith.constant 9.99999974E-6 : f32
    %235 = vector.broadcast %cst_68 : f32 to vector<1x128xf32>
    %236 = arith.addf %234, %235 : vector<1x128xf32>
    %237 = math.rsqrt %236 : vector<1x128xf32>
    %238 = vector.broadcast %237 : vector<1x128xf32> to vector<32x128xf32>
    %239 = arith.mulf %232, %238 : vector<32x128xf32>
    %240 = vector.broadcast %172 : vector<32x1xf32> to vector<32x128xf32>
    %241 = arith.mulf %239, %240 : vector<32x128xf32>
    %242 = vector.broadcast %173 : vector<32x1xf32> to vector<32x128xf32>
    %243 = arith.addf %241, %242 : vector<32x128xf32>
    %c1_69 = arith.constant 1 : index
    %c0_70 = arith.constant 0 : index
    %c0_71 = arith.constant 0 : index
    %244 = vector.load %arg5[%c1_69, %c0_70, %c0_71] : memref<2x64x32xbf16, #tpu.memory_space<vmem>>, vector<1x64x32xbf16>
    %245 = vector.shape_cast %244 : vector<1x64x32xbf16> to vector<64x32xbf16>
    %246 = arith.truncf %243 : vector<32x128xf32> to vector<32x128xbf16>
    %cst_72 = arith.constant dense<0.000000e+00> : vector<64x128xf32>
    %247 = tpu.matmul %245, %246, %cst_72 {dimension_numbers = #tpu.dot_dimension_numbers<[1], [0], [0], [1], [0, 0, 1, 1], [], []>} : vector<64x32xbf16>, vector<32x128xbf16>, vector<64x128xf32> -> vector<64x128xf32>
    %248 = vector.broadcast %174 : vector<64x1xf32> to vector<64x128xf32>
    %249 = arith.addf %247, %248 : vector<64x128xf32>
    %cst_73 = arith.constant 0.000000e+00 : f32
    %250 = vector.broadcast %cst_73 : f32 to vector<64x128xf32>
    %251 = arith.maximumf %249, %250 : vector<64x128xf32>
    %c1_74 = arith.constant 1 : index
    %c0_75 = arith.constant 0 : index
    %c0_76 = arith.constant 0 : index
    %252 = vector.load %arg6[%c1_74, %c0_75, %c0_76] : memref<2x32x64xbf16, #tpu.memory_space<vmem>>, vector<1x32x64xbf16>
    %253 = vector.shape_cast %252 : vector<1x32x64xbf16> to vector<32x64xbf16>
    %254 = arith.truncf %251 : vector<64x128xf32> to vector<64x128xbf16>
    %cst_77 = arith.constant dense<0.000000e+00> : vector<32x128xf32>
    %255 = tpu.matmul %253, %254, %cst_77 {dimension_numbers = #tpu.dot_dimension_numbers<[1], [0], [0], [1], [0, 0, 1, 1], [], []>} : vector<32x64xbf16>, vector<64x128xbf16>, vector<32x128xf32> -> vector<32x128xf32>
    %256 = vector.broadcast %175 : vector<32x1xf32> to vector<32x128xf32>
    %257 = arith.addf %255, %256 : vector<32x128xf32>
    %258 = arith.addf %243, %257 : vector<32x128xf32>
    %cst_78 = arith.constant dense<0.000000e+00> : vector<128xf32>
    %259 = vector.multi_reduction <add>, %258, %cst_78 [0] : vector<32x128xf32> to vector<128xf32>
    %260 = vector.shape_cast %259 : vector<128xf32> to vector<1x128xf32>
    %cst_79 = arith.constant 3.200000e+01 : f32
    %261 = vector.broadcast %cst_79 : f32 to vector<1x128xf32>
    %262 = arith.divf %260, %261 : vector<1x128xf32>
    %263 = arith.mulf %258, %258 : vector<32x128xf32>
    %cst_80 = arith.constant dense<0.000000e+00> : vector<128xf32>
    %264 = vector.multi_reduction <add>, %263, %cst_80 [0] : vector<32x128xf32> to vector<128xf32>
    %265 = vector.shape_cast %264 : vector<128xf32> to vector<1x128xf32>
    %cst_81 = arith.constant 3.200000e+01 : f32
    %266 = vector.broadcast %cst_81 : f32 to vector<1x128xf32>
    %267 = arith.divf %265, %266 : vector<1x128xf32>
    %268 = vector.broadcast %262 : vector<1x128xf32> to vector<32x128xf32>
    %269 = arith.subf %258, %268 : vector<32x128xf32>
    %270 = arith.mulf %262, %262 : vector<1x128xf32>
    %271 = arith.subf %267, %270 : vector<1x128xf32>
    %cst_82 = arith.constant 9.99999974E-6 : f32
    %272 = vector.broadcast %cst_82 : f32 to vector<1x128xf32>
    %273 = arith.addf %271, %272 : vector<1x128xf32>
    %274 = math.rsqrt %273 : vector<1x128xf32>
    %275 = vector.broadcast %274 : vector<1x128xf32> to vector<32x128xf32>
    %276 = arith.mulf %269, %275 : vector<32x128xf32>
    %277 = vector.broadcast %176 : vector<32x1xf32> to vector<32x128xf32>
    %278 = arith.mulf %276, %277 : vector<32x128xf32>
    %279 = vector.broadcast %177 : vector<32x1xf32> to vector<32x128xf32>
    %280 = arith.addf %278, %279 : vector<32x128xf32>
    %c0_83 = arith.constant 0 : index
    %c0_84 = arith.constant 0 : index
    %281 = vector.load %arg7[%c0_83, %c0_84] : memref<16x32xbf16, #tpu.memory_space<vmem>>, vector<16x32xbf16>
    %cst_85 = arith.constant dense<0.000000e+00> : vector<128xf32>
    %282 = vector.multi_reduction <add>, %280, %cst_85 [0] : vector<32x128xf32> to vector<128xf32>
    %283 = vector.shape_cast %282 : vector<128xf32> to vector<1x128xf32>
    %cst_86 = arith.constant 3.200000e+01 : f32
    %284 = vector.broadcast %cst_86 : f32 to vector<1x128xf32>
    %285 = arith.divf %283, %284 : vector<1x128xf32>
    %286 = arith.mulf %280, %280 : vector<32x128xf32>
    %cst_87 = arith.constant dense<0.000000e+00> : vector<128xf32>
    %287 = vector.multi_reduction <add>, %286, %cst_87 [0] : vector<32x128xf32> to vector<128xf32>
    %288 = vector.shape_cast %287 : vector<128xf32> to vector<1x128xf32>
    %cst_88 = arith.constant 3.200000e+01 : f32
    %289 = vector.broadcast %cst_88 : f32 to vector<1x128xf32>
    %290 = arith.divf %288, %289 : vector<1x128xf32>
    %291 = vector.broadcast %285 : vector<1x128xf32> to vector<32x128xf32>
    %292 = arith.subf %280, %291 : vector<32x128xf32>
    %293 = arith.mulf %285, %285 : vector<1x128xf32>
    %294 = arith.subf %290, %293 : vector<1x128xf32>
    %cst_89 = arith.constant 9.99999974E-6 : f32
    %295 = vector.broadcast %cst_89 : f32 to vector<1x128xf32>
    %296 = arith.addf %294, %295 : vector<1x128xf32>
    %297 = math.rsqrt %296 : vector<1x128xf32>
    %298 = vector.broadcast %297 : vector<1x128xf32> to vector<32x128xf32>
    %299 = arith.mulf %292, %298 : vector<32x128xf32>
    %300 = arith.truncf %299 : vector<32x128xf32> to vector<32x128xbf16>
    %cst_90 = arith.constant dense<0.000000e+00> : vector<16x128xf32>
    %301 = tpu.matmul %281, %300, %cst_90 {dimension_numbers = #tpu.dot_dimension_numbers<[1], [0], [0], [1], [0, 0, 1, 1], [], []>} : vector<16x32xbf16>, vector<32x128xbf16>, vector<16x128xf32> -> vector<16x128xf32>
    %302 = vector.broadcast %4 : vector<16x1xf32> to vector<16x128xf32>
    %303 = arith.addf %301, %302 : vector<16x128xf32>
    %cst_91 = arith.constant dense<0.000000e+00> : vector<128xf32>
    %304 = vector.multi_reduction <add>, %303, %cst_91 [0] : vector<16x128xf32> to vector<128xf32>
    %305 = vector.shape_cast %304 : vector<128xf32> to vector<1x128xf32>
    %cst_92 = arith.constant 1.600000e+01 : f32
    %306 = vector.broadcast %cst_92 : f32 to vector<1x128xf32>
    %307 = arith.divf %305, %306 : vector<1x128xf32>
    %308 = arith.mulf %303, %303 : vector<16x128xf32>
    %cst_93 = arith.constant dense<0.000000e+00> : vector<128xf32>
    %309 = vector.multi_reduction <add>, %308, %cst_93 [0] : vector<16x128xf32> to vector<128xf32>
    %310 = vector.shape_cast %309 : vector<128xf32> to vector<1x128xf32>
    %cst_94 = arith.constant 1.600000e+01 : f32
    %311 = vector.broadcast %cst_94 : f32 to vector<1x128xf32>
    %312 = arith.divf %310, %311 : vector<1x128xf32>
    %313 = vector.broadcast %307 : vector<1x128xf32> to vector<16x128xf32>
    %314 = arith.subf %303, %313 : vector<16x128xf32>
    %315 = arith.mulf %307, %307 : vector<1x128xf32>
    %316 = arith.subf %312, %315 : vector<1x128xf32>
    %cst_95 = arith.constant 9.99999974E-6 : f32
    %317 = vector.broadcast %cst_95 : f32 to vector<1x128xf32>
    %318 = arith.addf %316, %317 : vector<1x128xf32>
    %319 = math.rsqrt %318 : vector<1x128xf32>
    %320 = vector.broadcast %319 : vector<1x128xf32> to vector<16x128xf32>
    %321 = arith.mulf %314, %320 : vector<16x128xf32>
    %322 = vector.broadcast %5 : vector<16x1xf32> to vector<16x128xf32>
    %323 = arith.mulf %321, %322 : vector<16x128xf32>
    %324 = vector.broadcast %6 : vector<16x1xf32> to vector<16x128xf32>
    %325 = arith.addf %323, %324 : vector<16x128xf32>
    %c0_96 = arith.constant 0 : index
    %c0_97 = arith.constant 0 : index
    %326 = vector.load %arg10[%c0_96, %c0_97] : memref<16x128xf32, #tpu.memory_space<vmem>>, vector<16x128xf32>
    tpu.vector_store %arg10[%c0_96, %c0_97], %325 {strides = array<i32>} : memref<16x128xf32, #tpu.memory_space<vmem>>, vector<16x128xf32>,
    return
  }
}

</mosaic_0001>

<bundles_post_ra>
// kernel: bottleneck_forward.1
= control target key start
LH: loop header
LB: loop body
LE: loop exit
PB: predicated region body
PF: predicated region fallthrough
CT: control target
= control target key end

     0   :  { %vm118_vm0 = vcmask 130048   ;;  %v2600_v2 = vmov 0   ;;  %vm415_vm1 = vcmask 261120   ;;  %s2601_s23 = smov 64   ;;  %vm1011_vm2 = vcmask 523264   ;;  %s3316_s0 = inlined_call_operand.vmem [shape: f32[16,128], index: 0, kind: input, shape index: {}]   ;;  %s3317_s2 = inlined_call_operand.vmem [shape: bf16[32,16], index: 2, kind: input, shape index: {}]   ;;  %s3318_s8 = inlined_call_operand.vmem [shape: f32[144,1], index: 8, kind: input, shape index: {}]   ;;  %s3319_s9 = inlined_call_operand.vmem [shape: f32[2,352,1], index: 9, kind: input, shape index: {}]   ;;  %s3320_s3 = inlined_call_operand.vmem [shape: bf16[2,96,32], index: 3, kind: input, shape index: {}]   ;;  %s3321_s1 = inlined_call_operand.vmem [shape: f32[32,128], index: 1, kind: input, shape index: {}]   ;;  %s3322_s4 = inlined_call_operand.vmem [shape: bf16[2,32,32], index: 4, kind: input, shape index: {}]   ;;  %s3323_s5 = inlined_call_operand.vmem [shape: bf16[2,64,32], index: 5, kind: input, shape index: {}]   ;;  %s3324_s6 = inlined_call_operand.vmem [shape: bf16[2,32,64], index: 6, kind: input, shape index: {}]   ;;  %s3325_s7 = inlined_call_operand.vmem [shape: bf16[16,32], index: 7, kind: input, shape index: {}]   ;;  %s3326_s10 = inlined_call_operand.vmem [shape: f32[16,128], index: 10, kind: output, shape index: {}]  }
   0x1   :  { %v2662_v0 = vld [vmem:[%s3316_s0] sm:$0xff]  ;;  %v2667_v1 = vld [vmem:[%s3316_s0 + $0x8] sm:$0xff]  ;;  %2503 = vset.pattern.permute.xlu0 %v2600_v2  ;;  %2504 = vset.pattern.permute.xlu1 %v2600_v2  ;;  %v38_v10 = vld [vmem:[%s3318_s8 + $0x10] sm:$0xff]  ;;  %vm2603_vm3 = vmmov 0  }
   0x2   :  { %v60_v3 = vadd.f32 %v2667_v1, %v2662_v0  ;;  %v69_v4 = vmul.f32 %v2662_v0, %v2662_v0  ;;  %v70_v5 = vmul.f32 %v2667_v1, %v2667_v1  ;;  %v2505_v6 = vld [vmem:[%s3317_s2] sm:$0xff]   ;;  %100 = vperm.xlu1 %2504, %v38_v10   ;;  %v37_v11 = vld [vmem:[%s3318_s8 + $0x8] sm:$0xff]  ;;  %v39_v14 = vld [vmem:[%s3318_s8 + $0x18] sm:$0xff] }
   0x3   :  { %v36_v7 = vld [vmem:[%s3318_s8] sm:$0xff]  ;;  %2391 = vmatprep.mubr.msk.bf16.mxu0 %vm118_vm0, %v2505_v6  ;;  %v41_v20 = vld [vmem:[%s3318_s8 + $0x28] sm:$0xff]  ;;  %v42_v29 = vld [vmem:[%s3318_s8 + $0x30] sm:$0xff] }
   0x4   :  { %v61_v8 = vrot.slane %v60_v3, 4  ;;  %v71_v9 = vadd.f32 %v70_v5, %v69_v4  ;;  %90 = vperm.xlu0 %2503, %v36_v7   ;;  %v40_v17 = vld [vmem:[%s3318_s8 + $0x20] sm:$0xff]  ;;  %v45_v26 = vld [vmem:[%s3318_s8 + $0x48] sm:$0xff]  ;;  %v43_v32 = vld [vmem:[%s3318_s8 + $0x38] sm:$0xff] }
   0x5   :  { %v44_v23 = vld [vmem:[%s3318_s8 + $0x40] sm:$0xff]  ;;  %v46_v34 = vld [vmem:[%s3318_s8 + $0x50] sm:$0xff]  ;;  %v47_v36 = vld [vmem:[%s3318_s8 + $0x58] sm:$0xff] }
   0x6   :  { %v62_v12 = vadd.f32 %v61_v8, %v60_v3  ;;  %v72_v13 = vrot.slane %v71_v9, 4  ;;  %105 = vperm.xlu1 %2504, %v39_v14   ;;  %v271_v37 = vld [vmem:[%s3319_s9 + $0x20] sm:$0xff]  ;;  %v272_v38 = vld [vmem:[%s3319_s9 + $0x28] sm:$0xff]  ;;  %v273_v39 = vld [vmem:[%s3319_s9 + $0x30] sm:$0xff] }
   0x7   :  { %v274_v40 = vld [vmem:[%s3319_s9 + $0x38] sm:$0xff]  ;;  %v275_v43 = vld [vmem:[%s3319_s9 + $0x40] sm:$0xff]  ;;  %v276_v45 = vld [vmem:[%s3319_s9 + $0x48] sm:$0xff] }
   0x8   :  { %v63_v15 = vrot.slane %v62_v12, 2  ;;  %v73_v16 = vadd.f32 %v72_v13, %v71_v9  ;;  %95 = vperm.xlu0 %2503, %v37_v11   ;;  %v277_v49 = vld [vmem:[%s3319_s9 + $0x50] sm:$0xff]  ;;  %v278_v50 = vld [vmem:[%s3319_s9 + $0x58] sm:$0xff]  ;;  %v2506_v51 = vld [vmem:[%s3317_s2 + $0x8] sm:$0xff]  }
   0x9   :  { %v267_v52 = vld [vmem:[%s3319_s9] sm:$0xff]  ;;  %v268_v53 = vld [vmem:[%s3319_s9 + $0x8] sm:$0xff]  ;;  %v269_v54 = vld [vmem:[%s3319_s9 + $0x10] sm:$0xff] }
   0xa   :  { %v64_v18 = vadd.f32 %v63_v15, %v62_v12  ;;  %v74_v19 = vrot.slane %v73_v16, 2  ;;  %218 = vperm.xlu1 %2504, %v41_v20   ;;  %v270_v55 = vld [vmem:[%s3319_s9 + $0x18] sm:$0xff]  ;;  %v2507_v56 = vld [vmem:[%s3320_s3] sm:$0xff]  }
   0xb   :  { %2399 = vmatprep.mubr.msk.bf16.mxu1 %vm415_vm1, %v2507_v56  ;;  %v262_v56 = vld [vmem:[%s3321_s1 + $0x18] sm:$0xff] }
   0xc   :  { %v65_v21 = vrot.slane %v64_v18, 1  ;;  %v75_v22 = vadd.f32 %v74_v19, %v73_v16  ;;  %213 = vperm.xlu0 %2503, %v40_v17  }
   0xe   :  { %v66_v24 = vadd.f32 %v65_v21, %v64_v18  ;;  %v76_v25 = vrot.slane %v75_v22, 1  ;;  %242 = vperm.xlu1 %2504, %v45_v26  }
  0x10   :  { %v68_v27 = vmul.f32 0.0625, %v66_v24  ;;  %v77_v28 = vadd.f32 %v76_v25, %v75_v22  ;;  %237 = vperm.xlu0 %2503, %v44_v23  }
  0x12   :  { %v78_v30 = vmul.f32 0.0625, %v77_v28  ;;  %v81_v31 = vmul.f32 %v68_v27, %v68_v27  ;;  %228 = vperm.xlu1 %2504, %v43_v32   ;;  %v79_v41 = vsub.f32 %v2662_v0, %v68_v27  ;;  %v80_v42 = vsub.f32 %v2667_v1, %v68_v27 }
  0x14   :  { %v82_v33 = vsub.f32 %v78_v30, %v81_v31  ;;  %223 = vperm.xlu0 %2503, %v42_v29  }
  0x16   :  { %v83_v35 = vadd.f32 1e-05, %v82_v33  ;;  %252 = vperm.xlu1 %2504, %v47_v36  }
  0x18   :  { %2536 = vrsqrt.f32 %v83_v35  ;;  %247 = vperm.xlu0 %2503, %v46_v34  }
  0x1a   :  { %352 = vperm.xlu1 %2504, %v272_v38  }
  0x1c   :  { %347 = vperm.xlu0 %2503, %v271_v37  }
  0x1e   :  { %362 = vperm.xlu1 %2504, %v274_v40  }
  0x20   :  { %357 = vperm.xlu0 %2503, %v273_v39  }
  0x22   :  { %v2537_v44 = vpop.eup %2536  ;;  %372 = vperm.xlu1 %2504, %v276_v45  }
  0x23   :  { %v85_v46 = vmul.f32 %v2537_v44, %v79_v41  ;;  %v86_v47 = vmul.f32 %v2537_v44, %v80_v42 }
  0x24   :  { %367 = vperm.xlu0 %2503, %v275_v43  }
  0x25   :  { %v87_v48 = vpack.c.bf16 %v86_v47, %v85_v46 }
  0x26   :  { %382 = vperm.xlu1 %2504, %v278_v50  }
  0x27   :  { %2389 = vmatprep.subr.bf16.mxu0 %v87_v48 }
  0x28   :  { %2390 = vmatpush3.bf16.msra.mxu0 %v87_v48  ;;  %377 = vperm.xlu0 %2503, %v277_v49   ;;  %v259_v49 = vld [vmem:[%s3321_s1] sm:$0xff] }
  0x2a   :  { %332 = vperm.xlu1 %2504, %v268_v53  }
  0x2b   :  { %2392 = vmatmul.mubr.msk.bf16.vlgmr.msra.gmra.mrb[0].mxu0 %vm118_vm0, %v2506_v51 }
  0x2c   :  { %327 = vperm.xlu0 %2503, %v267_v52  }
  0x2e   :  { %342 = vperm.xlu1 %2504, %v270_v55   ;;  %v261_v55 = vld [vmem:[%s3321_s1 + $0x10] sm:$0xff] }
  0x30   :  { %337 = vperm.xlu0 %2503, %v269_v54   ;;  %v260_v54 = vld [vmem:[%s3321_s1 + $0x8] sm:$0xff] }
  0x81   :  { %v101_v58 = vpop.permute.xlu1 %100 }
  0x83   :  { %v91_v57 = vpop.permute.xlu0 %90 }
  0x85   :  { %v106_v3 = vpop.permute.xlu1 %105 }
  0x87   :  { %v96_v63 = vpop.permute.xlu0 %95 }
  0x89   :  { %v219_v35 = vpop.permute.xlu1 %218 }
  0x8b   :  { %v214_v34 = vpop.permute.xlu0 %213 }
  0x8d   :  { %v243_v39 = vpop.permute.xlu1 %242 }
  0x8f   :  { %v238_v38 = vpop.permute.xlu0 %237 }
  0x91   :  { %v229_v41 = vpop.permute.xlu1 %228 }
  0x93   :  { %v224_v40 = vpop.permute.xlu0 %223 }
  0x95   :  { %v253_v53 = vpop.permute.xlu1 %252 }
  0x97   :  { %v248_v52 = vpop.permute.xlu0 %247 }
  0xfe   :  { %v2393_v59 = vpop.f32.mrb[0].mxu0 }
  0xff   :  { %v159_v60 = vpop.f32.mrb[1].mxu0  ;;  %v168_v1 = vadd.f32 %v2393_v59, %v101_v58 }
 0x100   :  { %v160_v61 = vadd.f32 %v159_v60, %v91_v57  ;;  %v2394_v62 = vpop.f32.mrb[2].mxu0 }
 0x101   :  { %v162_v0 = vpop.f32.mrb[3].mxu0  ;;  %v171_v5 = vadd.f32 %v2394_v62, %v106_v3  ;;  %v187_v8 = vmul.f32 %v168_v1, %v168_v1  ;;  %v2508_v3 = vld [vmem:[%s3320_s3 + $0x8] sm:$0xff]  }
 0x102   :  { %v163_v2 = vadd.f32 %v162_v0, %v96_v63  ;;  %v185_v4 = vmul.f32 %v160_v61, %v160_v61 }
 0x103   :  { %v188_v11 = vmul.f32 %v171_v5, %v171_v5 }
 0x104   :  { %v174_v6 = vadd.f32 %v163_v2, %v160_v61  ;;  %v186_v7 = vmul.f32 %v163_v2, %v163_v2 }
 0x106   :  { %v175_v9 = vadd.f32 %v174_v6, %v168_v1  ;;  %v189_v10 = vadd.f32 %v186_v7, %v185_v4  ;;  %v2509_v4 = vld [vmem:[%s3320_s3 + $0x10] sm:$0xff]   ;;  %v2511_v6 = vld [vmem:[%s3320_s3 + $0x20] sm:$0xff]   ;;  %v2512_v7 = vld [vmem:[%s3320_s3 + $0x28] sm:$0xff]  }
 0x108   :  { %v176_v12 = vadd.f32 %v175_v9, %v171_v5  ;;  %v190_v13 = vadd.f32 %v189_v10, %v187_v8  ;;  %v348_v8 = vpop.permute.xlu0 %347  ;;  %v353_v9 = vpop.permute.xlu1 %352 }
 0x10a   :  { %v177_v14 = vrot.slane %v176_v12, 4  ;;  %v191_v15 = vadd.f32 %v190_v13, %v188_v11 }
 0x10c   :  { %v178_v16 = vadd.f32 %v177_v14, %v176_v12  ;;  %v192_v17 = vrot.slane %v191_v15, 4  ;;  %v358_v10 = vpop.permute.xlu0 %357  ;;  %v363_v11 = vpop.permute.xlu1 %362 }
 0x10e   :  { %v179_v18 = vrot.slane %v178_v16, 2  ;;  %v193_v19 = vadd.f32 %v192_v17, %v191_v15 }
 0x110   :  { %v180_v20 = vadd.f32 %v179_v18, %v178_v16  ;;  %v194_v21 = vrot.slane %v193_v19, 2  ;;  %v368_v12 = vpop.permute.xlu0 %367  ;;  %v373_v13 = vpop.permute.xlu1 %372 }
 0x112   :  { %v181_v22 = vrot.slane %v180_v20, 1  ;;  %v195_v23 = vadd.f32 %v194_v21, %v193_v19 }
 0x114   :  { %v182_v24 = vadd.f32 %v181_v22, %v180_v20  ;;  %v196_v25 = vrot.slane %v195_v23, 1  ;;  %v378_v14 = vpop.permute.xlu0 %377  ;;  %v383_v15 = vpop.permute.xlu1 %382 }
 0x116   :  { %v184_v26 = vmul.f32 0.03125, %v182_v24  ;;  %v197_v27 = vadd.f32 %v196_v25, %v195_v23 }
 0x118   :  { %v198_v28 = vmul.f32 0.03125, %v197_v27  ;;  %v200_v29 = vsub.f32 %v163_v2, %v184_v26  ;;  %v203_v30 = vmul.f32 %v184_v26, %v184_v26  ;;  %v199_v31 = vsub.f32 %v160_v61, %v184_v26  ;;  %v328_v18 = vpop.permute.xlu0 %327  ;;  %v333_v21 = vpop.permute.xlu1 %332 }
 0x119   :  { %v201_v32 = vsub.f32 %v168_v1, %v184_v26  ;;  %v202_v33 = vsub.f32 %v171_v5, %v184_v26  ;;  %v2510_v5 = vld [vmem:[%s3320_s3 + $0x18] sm:$0xff]  }
 0x11a   :  { %v204_v36 = vsub.f32 %v198_v28, %v203_v30 }
 0x11c   :  { %v205_v37 = vadd.f32 1e-05, %v204_v36  ;;  %v338_v22 = vpop.permute.xlu0 %337  ;;  %v343_v27 = vpop.permute.xlu1 %342 }
 0x11e   :  { %2538 = vrsqrt.f32 %v205_v37 }
 0x128   :  { %v2539_v42 = vpop.eup %2538 }
 0x129   :  { %v208_v43 = vmul.f32 %v2539_v42, %v200_v29  ;;  %v207_v44 = vmul.f32 %v2539_v42, %v199_v31  ;;  %v209_v45 = vmul.f32 %v2539_v42, %v201_v32  ;;  %v210_v46 = vmul.f32 %v2539_v42, %v202_v33 }
 0x12b   :  { %v231_v47 = vmul.f32 %v214_v34, %v207_v44  ;;  %v232_v48 = vmul.f32 %v219_v35, %v208_v43  ;;  %v233_v50 = vmul.f32 %v224_v40, %v209_v45  ;;  %v234_v51 = vmul.f32 %v229_v41, %v210_v46 }
 0x12d   :  { %v255_v57 = vadd.f32 %v238_v38, %v231_v47  ;;  %v256_v58 = vadd.f32 %v243_v39, %v232_v48  ;;  %v257_v59 = vadd.f32 %v248_v52, %v233_v50  ;;  %v258_v60 = vadd.f32 %v253_v53, %v234_v51  ;;  %v279_v48 = vld [vmem:[%s3319_s9 + $0x60] sm:$0xff]  ;;  %v281_v50 = vld [vmem:[%s3319_s9 + $0x70] sm:$0xff]  ;;  %v282_v51 = vld [vmem:[%s3319_s9 + $0x78] sm:$0xff] }
 0x12e   :  { %v283_v52 = vld [vmem:[%s3319_s9 + $0x80] sm:$0xff]  ;;  %v284_v53 = vld [vmem:[%s3319_s9 + $0x88] sm:$0xff] }
 0x12f   :  { %v2773_v61 = vadd.f32 %v259_v49, %v255_v57  ;;  %v2775_v62 = vadd.f32 %v260_v54, %v256_v58  ;;  %v2777_v63 = vadd.f32 %v261_v55, %v257_v59  ;;  %v2779_v0 = vadd.f32 %v262_v56, %v258_v60  ;;  %v280_v49 = vld [vmem:[%s3319_s9 + $0x68] sm:$0xff]  ;;  %v287_v54 = vld [vmem:[%s3319_s9 + $0xa0] sm:$0xff]  ;;  %v285_v56 = vld [vmem:[%s3319_s9 + $0x90] sm:$0xff] }
 0x130   :  { %v288_v55 = vld [vmem:[%s3319_s9 + $0xa8] sm:$0xff]  ;;  %v286_v57 = vld [vmem:[%s3319_s9 + $0x98] sm:$0xff]  ;;  %v289_v58 = vld [vmem:[%s3319_s9 + $0xb0] sm:$0xff] }
 0x131   :  { %v323_v1 = vpack.c.bf16 %v2775_v62, %v2773_v61  ;;  %v324_v2 = vpack.c.bf16 %v2779_v0, %v2777_v63  ;;  %v290_v59 = vld [vmem:[%s3319_s9 + $0xb8] sm:$0xff]  ;;  %v291_v60 = vld [vmem:[%s3319_s9 + $0xc0] sm:$0xff] }
 0x133   :  { %2395 = vmatprep.subr.bf16.mxu1 %v323_v1 }
 0x134   :  { %2396 = vmatpush3.bf16.msra.mxu1 %v323_v1  ;;  %v292_v1 = vld [vmem:[%s3319_s9 + $0xc8] sm:$0xff] }
 0x135   :  { %2397 = vmatprep.subr.bf16.mxu1 %v324_v2 }
 0x138   :  { %2398 = vmatpush3.bf16.msra.mxu1 %v324_v2  ;;  %v293_v2 = vld [vmem:[%s3319_s9 + $0xd0] sm:$0xff] }
 0x13b   :  { %2400 = vmatmul.mubr.msk.bf16.vlgmr.msra.gmra.mrb[0].mxu1 %vm415_vm1, %v2508_v3  ;;  %v294_v3 = vld [vmem:[%s3319_s9 + $0xd8] sm:$0xff] }
 0x13c   :  { %2403 = vmatprep.mubr.msk.bf16.mxu1 %vm415_vm1, %v2509_v4  ;;  %v2513_v4 = vld [vmem:[%s3322_s4] sm:$0xff]  }
 0x13d   :  { %2415 = vmatprep.mubr.msk.bf16.mxu0 %vm415_vm1, %v2513_v4 }
 0x143   :  { %2404 = vmatmul.mubr.msk.bf16.gmra.mrb[4].mxu1 %vm415_vm1, %v2510_v5  ;;  %v295_v5 = vld [vmem:[%s3319_s9 + $0xe0] sm:$0xff] }
 0x144   :  { %2407 = vmatprep.mubr.msk.bf16.mxu1 %vm415_vm1, %v2511_v6  ;;  %v296_v6 = vld [vmem:[%s3319_s9 + $0xe8] sm:$0xff] }
 0x14b   :  { %2408 = vmatmul.mubr.msk.bf16.gmra.mrb[8].mxu1 %vm415_vm1, %v2512_v7  ;;  %v297_v7 = vld [vmem:[%s3319_s9 + $0xf0] sm:$0xff] }
 0x20e   :  { %v2401_v16 = vpop.f32.mrb[0].mxu1 }
 0x20f   :  { %v468_v17 = vpop.f32.mrb[1].mxu1  ;;  %v2805_v24 = vadd.f32 %v2401_v16, %v338_v22  ;;  %v308_v16 = vld [vmem:[%s3319_s9 + $0x148] sm:$0xff] }
 0x210   :  { %v2402_v19 = vpop.f32.mrb[2].mxu1  ;;  %v2807_v28 = vadd.f32 %v468_v17, %v328_v18  ;;  %v305_v17 = vld [vmem:[%s3319_s9 + $0x130] sm:$0xff]  ;;  %v306_v18 = vld [vmem:[%s3319_s9 + $0x138] sm:$0xff]  ;;  %v2238_v22 = vld [vmem:[%s3319_s9 + $0x188] sm:$0xff] }
 0x211   :  { %v471_v20 = vpop.f32.mrb[3].mxu1  ;;  %v2809_v31 = vadd.f32 %v2402_v19, %v343_v27  ;;  %v309_v19 = vld [vmem:[%s3319_s9 + $0x150] sm:$0xff]  ;;  %v2242_v27 = vld [vmem:[%s3319_s9 + $0x1a8] sm:$0xff] }
 0x212   :  { %v2814_v35 = vadd.f32 %v471_v20, %v333_v21  ;;  %v310_v20 = vld [vmem:[%s3319_s9 + $0x158] sm:$0xff]  ;;  %v2237_v21 = vld [vmem:[%s3319_s9 + $0x180] sm:$0xff] }
 0x216   :  { %v2405_v23 = vpop.f32.mrb[4].mxu1 }
 0x217   :  { %v493_v25 = vadd.f32 %v2405_v23, %v358_v10  ;;  %v484_v26 = vpop.f32.mrb[5].mxu1  ;;  %v300_v10 = vld [vmem:[%s3319_s9 + $0x108] sm:$0xff]  ;;  %v2239_v23 = vld [vmem:[%s3319_s9 + $0x190] sm:$0xff] }
 0x218   :  { %v485_v29 = vadd.f32 %v484_v26, %v348_v8  ;;  %v2406_v30 = vpop.f32.mrb[6].mxu1  ;;  %v298_v8 = vld [vmem:[%s3319_s9 + $0xf8] sm:$0xff]  ;;  %v2241_v26 = vld [vmem:[%s3319_s9 + $0x1a0] sm:$0xff] }
 0x219   :  { %v2812_v32 = vmul.f32 %v493_v25, %v2805_v24  ;;  %v496_v33 = vadd.f32 %v2406_v30, %v363_v11  ;;  %v487_v34 = vpop.f32.mrb[7].mxu1  ;;  %v301_v11 = vld [vmem:[%s3319_s9 + $0x110] sm:$0xff]  ;;  %v2244_v30 = vld [vmem:[%s3319_s9 + $0x1b8] sm:$0xff] }
 0x21a   :  { %v2817_v36 = vmul.f32 %v485_v29, %v2807_v28  ;;  %v488_v37 = vadd.f32 %v487_v34, %v353_v9  ;;  %543 = vrot.lane.b32.xlu0 %v485_v29, %s2601_s23  ;;  %v299_v9 = vld [vmem:[%s3319_s9 + $0x100] sm:$0xff]  ;;  %v2243_v29 = vld [vmem:[%s3319_s9 + $0x1b0] sm:$0xff]  ;;  %v2234_v34 = vld [vmem:[%s3319_s9 + $0x168] sm:$0xff] }
 0x21b   :  { %v2821_v38 = vmul.f32 %v496_v33, %v2809_v31 }
 0x21c   :  { %v2824_v39 = vmul.f32 %v488_v37, %v2814_v35  ;;  %545 = vrot.lane.b32.xlu1 %v488_v37, %s2601_s23  ;;  %v2235_v37 = vld [vmem:[%s3319_s9 + $0x170] sm:$0xff] }
 0x21e   :  { %v2409_v40 = vpop.f32.mrb[8].mxu1  ;;  %547 = vrot.lane.b32.xlu0 %v493_v25, %s2601_s23  ;;  %v2240_v25 = vld [vmem:[%s3319_s9 + $0x198] sm:$0xff] }
 0x21f   :  { %v500_v41 = vpop.f32.mrb[9].mxu1  ;;  %v2835_v46 = vadd.f32 %v2409_v40, %v378_v14  ;;  %v304_v14 = vld [vmem:[%s3319_s9 + $0x128] sm:$0xff]  ;;  %v2236_v40 = vld [vmem:[%s3319_s9 + $0x178] sm:$0xff] }
 0x220   :  { %v2828_v42 = vadd.f32 %v500_v41, %v368_v12  ;;  %v2410_v43 = vpop.f32.mrb[10].mxu1  ;;  %549 = vrot.lane.b32.xlu1 %v496_v33, %s2601_s23  ;;  %v302_v12 = vld [vmem:[%s3319_s9 + $0x118] sm:$0xff]  ;;  %v2233_v33 = vld [vmem:[%s3319_s9 + $0x160] sm:$0xff]  ;;  %v519_v41 = vrot.slane %v2817_v36, 4 }
 0x221   :  { %v503_v44 = vpop.f32.mrb[11].mxu1  ;;  %v2839_v47 = vadd.f32 %v2410_v43, %v383_v15  ;;  %v307_v15 = vld [vmem:[%s3319_s9 + $0x140] sm:$0xff]  ;;  %v525_v43 = vrot.slane %v2824_v39, 4 }
 0x222   :  { %v2831_v45 = vadd.f32 %v503_v44, %v373_v13  ;;  %551 = vrot.lane.b32.xlu0 %v2828_v42, %s2601_s23  ;;  %v303_v13 = vld [vmem:[%s3319_s9 + $0x120] sm:$0xff]  ;;  %v520_v44 = vadd.f32 %v519_v41, %v2817_v36 }
 0x224   :  { %553 = vrot.lane.b32.xlu1 %v2831_v45, %s2601_s23 }
 0x226   :  { %555 = vrot.lane.b32.xlu0 %v2835_v46, %s2601_s23 }
 0x228   :  { %557 = vrot.lane.b32.xlu1 %v2839_v47, %s2601_s23 }
 0x22a   :  { %647 = vperm.xlu0 %2503, %v279_v48   ;;  %v531_v48 = vrot.slane %v2812_v32, 4 }
 0x22c   :  { %652 = vperm.xlu1 %2504, %v280_v49   ;;  %v526_v49 = vadd.f32 %v525_v43, %v2824_v39 }
 0x22e   :  { %657 = vperm.xlu0 %2503, %v281_v50   ;;  %v521_v50 = vrot.slane %v520_v44, 2 }
 0x230   :  { %662 = vperm.xlu1 %2504, %v282_v51   ;;  %v537_v51 = vrot.slane %v2821_v38, 4 }
 0x232   :  { %772 = vperm.xlu0 %2503, %v283_v52   ;;  %v538_v36 = vadd.f32 %v537_v51, %v2821_v38 }
 0x234   :  { %777 = vperm.xlu1 %2504, %v284_v53  }
 0x236   :  { %796 = vperm.xlu0 %2503, %v287_v54   ;;  %v532_v54 = vadd.f32 %v531_v48, %v2812_v32 }
 0x238   :  { %801 = vperm.xlu1 %2504, %v288_v55   ;;  %v527_v55 = vrot.slane %v526_v49, 2 }
 0x23a   :  { %782 = vperm.xlu0 %2503, %v285_v56   ;;  %v528_v4 = vadd.f32 %v527_v55, %v526_v49 }
 0x23c   :  { %787 = vperm.xlu1 %2504, %v286_v57  }
 0x23e   :  { %806 = vperm.xlu0 %2503, %v289_v58  }
 0x240   :  { %811 = vperm.xlu1 %2504, %v290_v59   ;;  %v522_v59 = vadd.f32 %v521_v50, %v520_v44 }
 0x242   :  { %830 = vperm.xlu0 %2503, %v291_v60  }
 0x244   :  { %835 = vperm.xlu1 %2504, %v292_v1  }
 0x246   :  { %840 = vperm.xlu0 %2503, %v293_v2  }
 0x248   :  { %845 = vperm.xlu1 %2504, %v294_v3   ;;  %v533_v3 = vrot.slane %v532_v54, 2 }
 0x24a   :  { %850 = vperm.xlu0 %2503, %v295_v5   ;;  %v534_v38 = vadd.f32 %v533_v3, %v532_v54 }
 0x24c   :  { %855 = vperm.xlu1 %2504, %v296_v6  }
 0x24e   :  { %860 = vperm.xlu0 %2503, %v297_v7  }
 0x250   :  { %865 = vperm.xlu1 %2504, %v298_v8   ;;  %v523_v8 = vrot.slane %v522_v59, 1 }
 0x252   :  { %983 = vperm.xlu0 %2503, %v299_v9   ;;  %v539_v9 = vrot.slane %v538_v36, 2 }
 0x254   :  { %988 = vperm.xlu1 %2504, %v300_v10  }
 0x256   :  { %993 = vperm.xlu0 %2503, %v301_v11  }
 0x258   :  { %998 = vperm.xlu1 %2504, %v302_v12  }
 0x25a   :  { %1109 = vperm.xlu0 %2503, %v303_v13   ;;  %v529_v13 = vrot.slane %v528_v4, 1 }
 0x25c   :  { %1114 = vperm.xlu1 %2504, %v304_v14  }
 0x25e   :  { %1133 = vperm.xlu0 %2503, %v307_v15  }
 0x260   :  { %1138 = vperm.xlu1 %2504, %v308_v16  }
 0x262   :  { %1119 = vperm.xlu0 %2503, %v305_v17   ;;  %v524_v17 = vadd.f32 %v523_v8, %v522_v59 }
 0x264   :  { %1124 = vperm.xlu1 %2504, %v306_v18   ;;  %v540_v18 = vadd.f32 %v539_v9, %v538_v36 }
 0x266   :  { %1143 = vperm.xlu0 %2503, %v309_v19  }
 0x268   :  { %1148 = vperm.xlu1 %2504, %v310_v20  }
 0x26a   :  { %1237 = vperm.xlu0 %2503, %v2237_v21  }
 0x26c   :  { %1242 = vperm.xlu1 %2504, %v2238_v22  }
 0x26e   :  { %1247 = vperm.xlu0 %2503, %v2239_v23   ;;  %v535_v23 = vrot.slane %v534_v38, 1 }
 0x270   :  { %1252 = vperm.xlu1 %2504, %v2240_v25   ;;  %v536_v41 = vadd.f32 %v535_v23, %v534_v38 }
 0x272   :  { %1257 = vperm.xlu0 %2503, %v2241_v26  }
 0x274   :  { %1262 = vperm.xlu1 %2504, %v2242_v27  }
 0x276   :  { %1267 = vperm.xlu0 %2503, %v2243_v29  }
 0x278   :  { %1272 = vperm.xlu1 %2504, %v2244_v30   ;;  %v541_v30 = vrot.slane %v540_v18, 1 }
 0x27a   :  { %1217 = vperm.xlu0 %2503, %v2233_v33   ;;  %v542_v51 = vadd.f32 %v541_v30, %v540_v18 }
 0x27c   :  { %1222 = vperm.xlu1 %2504, %v2234_v34  }
 0x27e   :  { %1227 = vperm.xlu0 %2503, %v2235_v37  }
 0x280   :  { %1232 = vperm.xlu1 %2504, %v2236_v40  }
 0x28c   :  { %v544_v52 = vpop.permute.xlu0 %543 }
 0x28d   :  { %v559_v53 = vmul.f32 %v544_v52, %v2807_v28 }
 0x28e   :  { %v546_v56 = vpop.permute.xlu1 %545 }
 0x28f   :  { %v563_v57 = vrot.slane %v559_v53, 4  ;;  %v560_v58 = vmul.f32 %v546_v56, %v2814_v35 }
 0x290   :  { %v548_v60 = vpop.permute.xlu0 %547 }
 0x291   :  { %v564_v1 = vadd.f32 %v563_v57, %v559_v53  ;;  %v569_v2 = vrot.slane %v560_v58, 4  ;;  %v561_v39 = vmul.f32 %v548_v60, %v2805_v24 }
 0x292   :  { %v550_v5 = vpop.permute.xlu1 %549 }
 0x293   :  { %v565_v6 = vrot.slane %v564_v1, 2  ;;  %v570_v28 = vadd.f32 %v569_v2, %v560_v58  ;;  %v575_v7 = vrot.slane %v561_v39, 4  ;;  %v562_v32 = vmul.f32 %v550_v5, %v2809_v31 }
 0x294   :  { %v530_v31 = vadd.f32 %v529_v13, %v528_v4  ;;  %v552_v4 = vpop.permute.xlu0 %551 }
 0x295   :  { %v566_v10 = vadd.f32 %v565_v6, %v564_v1  ;;  %v571_v35 = vrot.slane %v570_v28, 2  ;;  %v576_v11 = vadd.f32 %v575_v7, %v561_v39  ;;  %v581_v12 = vrot.slane %v562_v32, 4 }
 0x296   :  { %v554_v8 = vpop.permute.xlu1 %553 }
 0x297   :  { %v567_v14 = vrot.slane %v566_v10, 1  ;;  %v572_v15 = vadd.f32 %v571_v35, %v570_v28  ;;  %v577_v16 = vrot.slane %v576_v11, 2  ;;  %v582_v24 = vadd.f32 %v581_v12, %v562_v32 }
 0x299   :  { %v568_v19 = vadd.f32 %v567_v14, %v566_v10  ;;  %v573_v20 = vrot.slane %v572_v15, 1  ;;  %v578_v21 = vadd.f32 %v577_v16, %v576_v11  ;;  %v583_v22 = vrot.slane %v582_v24, 2  ;;  %v556_v16 = vpop.permute.xlu0 %555 }
 0x29b   :  { %v587_v25 = vmax.f32 %v524_v17, %v568_v19  ;;  %v574_v26 = vadd.f32 %v573_v20, %v572_v15  ;;  %v579_v27 = vrot.slane %v578_v21, 1  ;;  %v584_v29 = vadd.f32 %v583_v22, %v582_v24  ;;  %v558_v20 = vpop.permute.xlu1 %557 }
 0x29d   :  { %v591_v33 = vsub.f32 %v524_v17, %v587_v25  ;;  %v603_v34 = vsub.f32 %v568_v19, %v587_v25  ;;  %v588_v37 = vmax.f32 %v530_v31, %v574_v26  ;;  %v580_v40 = vadd.f32 %v579_v27, %v578_v21 }
 0x29e   :  { %v585_v43 = vrot.slane %v584_v29, 1 }
 0x29f   :  { %v595_v44 = vmul.f32 1.442695, %v591_v33  ;;  %v607_v48 = vmul.f32 1.442695, %v603_v34  ;;  %v592_v49 = vsub.f32 %v530_v31, %v588_v37  ;;  %v604_v50 = vsub.f32 %v574_v26, %v588_v37 }
 0x2a0   :  { %v589_v52 = vmax.f32 %v536_v41, %v580_v40  ;;  %v586_v53 = vadd.f32 %v585_v43, %v584_v29 }
 0x2a1   :  { %2540 = vpow2.f32 %v595_v44  ;;  %v597_v54 = vmul.f32 1.442695, %v592_v49  ;;  %v609_v55 = vmul.f32 1.442695, %v604_v50 }
 0x2a2   :  { %2542 = vpow2.f32 %v607_v48  ;;  %v593_v56 = vsub.f32 %v536_v41, %v589_v52  ;;  %v605_v57 = vsub.f32 %v580_v40, %v589_v52  ;;  %v590_v58 = vmax.f32 %v542_v51, %v586_v53  ;;  %v2515_v40 = vld [vmem:[%s3323_s5] sm:$0xff]  }
 0x2a3   :  { %2544 = vpow2.f32 %v597_v54 }
 0x2a4   :  { %2546 = vpow2.f32 %v609_v55  ;;  %v599_v59 = vmul.f32 1.442695, %v593_v56  ;;  %v611_v36 = vmul.f32 1.442695, %v605_v57  ;;  %v594_v60 = vsub.f32 %v542_v51, %v590_v58 }
 0x2a5   :  { %v606_v1 = vsub.f32 %v586_v53, %v590_v58 }
 0x2a6   :  { %2548 = vpow2.f32 %v599_v59  ;;  %v601_v2 = vmul.f32 1.442695, %v594_v60 }
 0x2a7   :  { %2550 = vpow2.f32 %v611_v36  ;;  %v613_v39 = vmul.f32 1.442695, %v606_v1 }
 0x2a8   :  { %2552 = vpow2.f32 %v601_v2 }
 0x2a9   :  { %2554 = vpow2.f32 %v613_v39  ;;  %v648_v41 = vpop.permute.xlu0 %647 }
 0x2ab   :  { %v2541_v3 = vpop.eup %2540  ;;  %v653_v43 = vpop.permute.xlu1 %652 }
 0x2ac   :  { %v2543_v5 = vpop.eup %2542  ;;  %v623_v6 = vmul.f32 %v2541_v3, %v2828_v42 }
 0x2ad   :  { %v2545_v28 = vpop.eup %2544  ;;  %v615_v7 = vadd.f32 %v2543_v5, %v2541_v3  ;;  %v627_v32 = vmul.f32 %v2543_v5, %v552_v4  ;;  %v658_v48 = vpop.permute.xlu0 %657 }
 0x2ae   :  { %v2547_v9 = vpop.eup %2546  ;;  %v624_v10 = vmul.f32 %v2545_v28, %v2831_v45 }
 0x2af   :  { %2556 = vrcp.f32 %v615_v7  ;;  %v631_v35 = vadd.f32 %v627_v32, %v623_v6  ;;  %v616_v11 = vadd.f32 %v2547_v9, %v2545_v28  ;;  %v628_v12 = vmul.f32 %v2547_v9, %v554_v8  ;;  %v663_v53 = vpop.permute.xlu1 %662 }
 0x2b0   :  { %v2549_v38 = vpop.eup %2548 }
 0x2b1   :  { %v2551_v13 = vpop.eup %2550  ;;  %2558 = vrcp.f32 %v616_v11  ;;  %v632_v14 = vadd.f32 %v628_v12, %v624_v10  ;;  %v625_v15 = vmul.f32 %v2549_v38, %v2835_v46 }
 0x2b2   :  { %v2553_v24 = vpop.eup %2552  ;;  %v617_v42 = vadd.f32 %v2551_v13, %v2549_v38  ;;  %v629_v17 = vmul.f32 %v2551_v13, %v556_v16 }
 0x2b3   :  { %v2555_v18 = vpop.eup %2554  ;;  %v626_v19 = vmul.f32 %v2553_v24, %v2839_v47  ;;  %v2514_v47 = vld [vmem:[%s3322_s4 + $0x8] sm:$0xff]  }
 0x2b4   :  { %2560 = vrcp.f32 %v617_v42  ;;  %v633_v45 = vadd.f32 %v629_v17, %v625_v15  ;;  %v618_v21 = vadd.f32 %v2555_v18, %v2553_v24  ;;  %v630_v22 = vmul.f32 %v2555_v18, %v558_v20  ;;  %v773_v18 = vpop.permute.xlu0 %772 }
 0x2b6   :  { %2562 = vrcp.f32 %v618_v21  ;;  %v634_v23 = vadd.f32 %v630_v22, %v626_v19  ;;  %v778_v19 = vpop.permute.xlu1 %777 }
 0x2b8   :  { %v797_v21 = vpop.permute.xlu0 %796 }
 0x2b9   :  { %v2557_v31 = vpop.eup %2556 }
 0x2ba   :  { %v635_v25 = vmul.f32 %v2557_v31, %v631_v35  ;;  %v802_v22 = vpop.permute.xlu1 %801 }
 0x2bb   :  { %v2559_v26 = vpop.eup %2558 }
 0x2bc   :  { %v636_v27 = vmul.f32 %v2559_v26, %v632_v14 }
 0x2be   :  { %v2561_v29 = vpop.eup %2560  ;;  %v643_v46 = vpack.c.bf16 %v636_v27, %v635_v25  ;;  %v788_v31 = vpop.permute.xlu1 %787 }
 0x2bf   :  { %v637_v30 = vmul.f32 %v2561_v29, %v633_v45 }
 0x2c0   :  { %v2563_v33 = vpop.eup %2562  ;;  %2411 = vmatprep.subr.bf16.mxu0 %v643_v46 }
 0x2c1   :  { %v638_v34 = vmul.f32 %v2563_v33, %v634_v23  ;;  %2412 = vmatpush3.bf16.msra.mxu0 %v643_v46  ;;  %v783_v23 = vpop.permute.xlu0 %782 }
 0x2c3   :  { %v644_v37 = vpack.c.bf16 %v638_v34, %v637_v30 }
 0x2c5   :  { %2413 = vmatprep.subr.bf16.mxu0 %v644_v37 }
 0x2c6   :  { %2414 = vmatpush3.bf16.msra.mxu0 %v644_v37 }
 0x2c9   :  { %2416 = vmatmul.mubr.msk.bf16.vlgmr.msra.gmra.mrb[4].mxu0 %vm415_vm1, %v2514_v47  ;;  %v807_v47 = vpop.permute.xlu0 %806 }
 0x2ca   :  { %2423 = vmatprep.mubr.msk.bf16.mxu0 %vm415_vm1, %v2515_v40  ;;  %v812_v40 = vpop.permute.xlu1 %811 }
 0x39c   :  { %v2417_v44 = vpop.f32.mrb[4].mxu0 }
 0x39d   :  { %v715_v49 = vpop.f32.mrb[5].mxu0  ;;  %v724_v50 = vadd.f32 %v2417_v44, %v658_v48 }
 0x39e   :  { %v716_v51 = vadd.f32 %v715_v49, %v648_v41  ;;  %v2418_v52 = vpop.f32.mrb[6].mxu0 }
 0x39f   :  { %v718_v54 = vpop.f32.mrb[7].mxu0  ;;  %v727_v56 = vadd.f32 %v2418_v52, %v663_v53  ;;  %v732_v58 = vadd.f32 %v724_v50, %v2777_v63  ;;  %v2517_v52 = vld [vmem:[%s3323_s5 + $0x10] sm:$0xff]   ;;  %v2518_v53 = vld [vmem:[%s3323_s5 + $0x18] sm:$0xff]  }
 0x3a0   :  { %v730_v55 = vadd.f32 %v716_v51, %v2773_v61  ;;  %v719_v57 = vadd.f32 %v718_v54, %v653_v43  ;;  %v2516_v51 = vld [vmem:[%s3323_s5 + $0x8] sm:$0xff]   ;;  %v2519_v54 = vld [vmem:[%s3324_s6] sm:$0xff]  }
 0x3a1   :  { %v733_v60 = vadd.f32 %v727_v56, %v2779_v0  ;;  %v746_v39 = vmul.f32 %v732_v58, %v732_v58  ;;  %2439 = vmatprep.mubr.msk.bf16.mxu1 %vm1011_vm2, %v2519_v54  ;;  %v836_v56 = vpop.permute.xlu1 %835 }
 0x3a2   :  { %v731_v59 = vadd.f32 %v719_v57, %v2775_v62  ;;  %v744_v36 = vmul.f32 %v730_v55, %v730_v55 }
 0x3a3   :  { %v747_v5 = vmul.f32 %v733_v60, %v733_v60 }
 0x3a4   :  { %v734_v1 = vadd.f32 %v731_v59, %v730_v55  ;;  %v745_v2 = vmul.f32 %v731_v59, %v731_v59 }
 0x3a6   :  { %v735_v3 = vadd.f32 %v734_v1, %v732_v58  ;;  %v748_v4 = vadd.f32 %v745_v2, %v744_v36 }
 0x3a8   :  { %v736_v6 = vadd.f32 %v735_v3, %v733_v60  ;;  %v749_v28 = vadd.f32 %v748_v4, %v746_v39 }
 0x3aa   :  { %v737_v7 = vrot.slane %v736_v6, 4  ;;  %v750_v32 = vadd.f32 %v749_v28, %v747_v5 }
 0x3ac   :  { %v738_v61 = vadd.f32 %v737_v7, %v736_v6  ;;  %v751_v8 = vrot.slane %v750_v32, 4 }
 0x3ae   :  { %v739_v9 = vrot.slane %v738_v61, 2  ;;  %v752_v10 = vadd.f32 %v751_v8, %v750_v32 }
 0x3b0   :  { %v740_v63 = vadd.f32 %v739_v9, %v738_v61  ;;  %v753_v35 = vrot.slane %v752_v10, 2 }
 0x3b2   :  { %v741_v62 = vrot.slane %v740_v63, 1  ;;  %v754_v11 = vadd.f32 %v753_v35, %v752_v10 }
 0x3b4   :  { %v742_v12 = vadd.f32 %v741_v62, %v740_v63  ;;  %v755_v0 = vrot.slane %v754_v11, 1 }
 0x3b6   :  { %v743_v38 = vmul.f32 0.03125, %v742_v12  ;;  %v756_v13 = vadd.f32 %v755_v0, %v754_v11 }
 0x3b8   :  { %v757_v14 = vmul.f32 0.03125, %v756_v13  ;;  %v759_v15 = vsub.f32 %v731_v59, %v743_v38  ;;  %v762_v16 = vmul.f32 %v743_v38, %v743_v38  ;;  %v758_v24 = vsub.f32 %v730_v55, %v743_v38  ;;  %v831_v55 = vpop.permute.xlu0 %830 }
 0x3b9   :  { %v760_v42 = vsub.f32 %v732_v58, %v743_v38  ;;  %v761_v17 = vsub.f32 %v733_v60, %v743_v38  ;;  %v846_v58 = vpop.permute.xlu1 %845 }
 0x3ba   :  { %v763_v20 = vsub.f32 %v757_v14, %v762_v16 }
 0x3bc   :  { %v764_v45 = vadd.f32 1e-05, %v763_v20  ;;  %v841_v57 = vpop.permute.xlu0 %840  ;;  %v2521_v20 = vld [vmem:[%s3320_s3 + $0x30] sm:$0xff]  }
 0x3bd   :  { %v856_v5 = vpop.permute.xlu1 %855 }
 0x3be   :  { %2564 = vrsqrt.f32 %v764_v45 }
 0x3c0   :  { %v851_v1 = vpop.permute.xlu0 %850 }
 0x3c1   :  { %v866_v11 = vpop.permute.xlu1 %865 }
 0x3c4   :  { %v861_v9 = vpop.permute.xlu0 %860 }
 0x3c8   :  { %v2565_v25 = vpop.eup %2564  ;;  %v984_v45 = vpop.permute.xlu0 %983 }
 0x3c9   :  { %v767_v26 = vmul.f32 %v2565_v25, %v759_v15  ;;  %v766_v27 = vmul.f32 %v2565_v25, %v758_v24  ;;  %v768_v29 = vmul.f32 %v2565_v25, %v760_v42  ;;  %v769_v46 = vmul.f32 %v2565_v25, %v761_v17 }
 0x3cb   :  { %v790_v30 = vmul.f32 %v773_v18, %v766_v27  ;;  %v791_v33 = vmul.f32 %v778_v19, %v767_v26  ;;  %v792_v34 = vmul.f32 %v783_v23, %v768_v29  ;;  %v793_v37 = vmul.f32 %v788_v31, %v769_v46  ;;  %v2520_v19 = vld [vmem:[%s3324_s6 + $0x8] sm:$0xff]  }
 0x3cc   :  { %v994_v23 = vpop.permute.xlu0 %993 }
 0x3cd   :  { %v3009_v41 = vadd.f32 %v797_v21, %v790_v30  ;;  %v3011_v43 = vadd.f32 %v802_v22, %v791_v33  ;;  %v3013_v44 = vadd.f32 %v807_v47, %v792_v34  ;;  %v3015_v48 = vadd.f32 %v812_v40, %v793_v37  ;;  %v989_v21 = vpop.permute.xlu1 %988 }
 0x3cf   :  { %v826_v49 = vpack.c.bf16 %v3011_v43, %v3009_v41  ;;  %v827_v50 = vpack.c.bf16 %v3015_v48, %v3013_v44 }
 0x3d1   :  { %2419 = vmatprep.subr.bf16.mxu0 %v826_v49  ;;  %v999_v29 = vpop.permute.xlu1 %998 }
 0x3d2   :  { %2420 = vmatpush3.bf16.msra.mxu0 %v826_v49 }
 0x3d3   :  { %2421 = vmatprep.subr.bf16.mxu0 %v827_v50 }
 0x3d6   :  { %2422 = vmatpush3.bf16.msra.mxu0 %v827_v50 }
 0x3d9   :  { %2424 = vmatmul.mubr.msk.bf16.vlgmr.msra.gmra.mrb[8].mxu0 %vm415_vm1, %v2516_v51 }
 0x3da   :  { %2427 = vmatprep.mubr.msk.bf16.mxu0 %vm415_vm1, %v2517_v52 }
 0x3e1   :  { %2428 = vmatmul.mubr.msk.bf16.gmra.mrb[12].mxu0 %vm415_vm1, %v2518_v53 }
 0x3e2   :  { %2447 = vmatprep.mubr.msk.bf16.mxu0 %vm415_vm1, %v2521_v20 }
 0x4ac   :  { %v2425_v59 = vpop.f32.mrb[8].mxu0 }
 0x4ad   :  { %v943_v36 = vadd.f32 %v2425_v59, %v841_v57  ;;  %v934_v60 = vpop.f32.mrb[9].mxu0 }
 0x4ae   :  { %v935_v2 = vadd.f32 %v934_v60, %v831_v55  ;;  %v2426_v39 = vpop.f32.mrb[10].mxu0 }
 0x4af   :  { %v946_v3 = vadd.f32 %v2426_v39, %v846_v58  ;;  %v937_v4 = vpop.f32.mrb[11].mxu0  ;;  %v967_v28 = vmax.f32 %v943_v36, 0.0 }
 0x4b0   :  { %v938_v6 = vadd.f32 %v937_v4, %v836_v56  ;;  %v965_v32 = vmax.f32 %v935_v2, 0.0 }
 0x4b1   :  { %v968_v7 = vmax.f32 %v946_v3, 0.0 }
 0x4b2   :  { %v966_v61 = vmax.f32 %v938_v6, 0.0 }
 0x4b3   :  { %v978_v8 = vpack.c.bf16 %v968_v7, %v967_v28 }
 0x4b4   :  { %v977_v10 = vpack.c.bf16 %v966_v61, %v965_v32  ;;  %v2429_v63 = vpop.f32.mrb[12].mxu0 }
 0x4b5   :  { %v959_v35 = vadd.f32 %v2429_v63, %v861_v9  ;;  %v950_v62 = vpop.f32.mrb[13].mxu0  ;;  %v1110_v9 = vpop.permute.xlu0 %1109 }
 0x4b6   :  { %v951_v12 = vadd.f32 %v950_v62, %v851_v1  ;;  %v2430_v0 = vpop.f32.mrb[14].mxu0  ;;  %2431 = vmatprep.subr.bf16.mxu1 %v977_v10 }
 0x4b7   :  { %v962_v38 = vadd.f32 %v2430_v0, %v866_v11  ;;  %v953_v13 = vpop.f32.mrb[15].mxu0  ;;  %2432 = vmatpush3.bf16.msra.mxu1 %v977_v10  ;;  %v971_v15 = vmax.f32 %v959_v35, 0.0  ;;  %v1115_v10 = vpop.permute.xlu1 %1114 }
 0x4b8   :  { %v954_v14 = vadd.f32 %v953_v13, %v856_v5  ;;  %2433 = vmatprep.subr.bf16.mxu1 %v978_v8  ;;  %v969_v24 = vmax.f32 %v951_v12, 0.0 }
 0x4b9   :  { %v972_v16 = vmax.f32 %v962_v38, 0.0  ;;  %v1134_v62 = vpop.permute.xlu0 %1133 }
 0x4ba   :  { %v970_v42 = vmax.f32 %v954_v14, 0.0 }
 0x4bb   :  { %v980_v17 = vpack.c.bf16 %v972_v16, %v971_v15  ;;  %2434 = vmatpush3.bf16.msra.mxu1 %v978_v8  ;;  %v1139_v11 = vpop.permute.xlu1 %1138 }
 0x4bc   :  { %v979_v18 = vpack.c.bf16 %v970_v42, %v969_v24 }
 0x4bd   :  { %v1120_v12 = vpop.permute.xlu0 %1119 }
 0x4be   :  { %2435 = vmatprep.subr.bf16.mxu1 %v979_v18 }
 0x4bf   :  { %2436 = vmatpush3.bf16.msra.mxu1 %v979_v18  ;;  %v1125_v0 = vpop.permute.xlu1 %1124 }
 0x4c0   :  { %2437 = vmatprep.subr.bf16.mxu1 %v980_v17 }
 0x4c3   :  { %2438 = vmatpush3.bf16.msra.mxu1 %v980_v17  ;;  %v1149_v20 = vpop.permute.xlu1 %1148 }
 0x4c6   :  { %2440 = vmatmul.mubr.msk.bf16.vlgmr.msra.gmra.mrb[12].mxu1 %vm1011_vm2, %v2520_v19  ;;  %v1144_v19 = vpop.permute.xlu0 %1143 }
 0x599   :  { %v2441_v22 = vpop.f32.mrb[12].mxu1 }
 0x59a   :  { %v1052_v31 = vpop.f32.mrb[13].mxu1  ;;  %v1061_v25 = vadd.f32 %v2441_v22, %v994_v23 }
 0x59b   :  { %v1053_v26 = vadd.f32 %v1052_v31, %v984_v45  ;;  %v2442_v27 = vpop.f32.mrb[14].mxu1 }
 0x59c   :  { %v1055_v46 = vpop.f32.mrb[15].mxu1  ;;  %v1064_v33 = vadd.f32 %v2442_v27, %v999_v29  ;;  %v1069_v37 = vadd.f32 %v1061_v25, %v3013_v44  ;;  %v2523_v27 = vld [vmem:[%s3320_s3 + $0x40] sm:$0xff]   ;;  %v2524_v29 = vld [vmem:[%s3320_s3 + $0x48] sm:$0xff]  }
 0x59d   :  { %v1067_v30 = vadd.f32 %v1053_v26, %v3009_v41  ;;  %v1056_v34 = vadd.f32 %v1055_v46, %v989_v21  ;;  %v2522_v26 = vld [vmem:[%s3320_s3 + $0x38] sm:$0xff]   ;;  %v2525_v46 = vld [vmem:[%s3320_s3 + $0x50] sm:$0xff]  }
 0x59e   :  { %v1070_v49 = vadd.f32 %v1064_v33, %v3015_v48  ;;  %v1083_v52 = vmul.f32 %v1069_v37, %v1069_v37  ;;  %v1238_v33 = vpop.permute.xlu0 %1237 }
 0x59f   :  { %v1068_v47 = vadd.f32 %v1056_v34, %v3011_v43  ;;  %v1081_v40 = vmul.f32 %v1067_v30, %v1067_v30  ;;  %v1243_v34 = vpop.permute.xlu1 %1242 }
 0x5a0   :  { %v1084_v55 = vmul.f32 %v1070_v49, %v1070_v49 }
 0x5a1   :  { %v1071_v50 = vadd.f32 %v1068_v47, %v1067_v30  ;;  %v1082_v51 = vmul.f32 %v1068_v47, %v1068_v47 }
 0x5a3   :  { %v1072_v53 = vadd.f32 %v1071_v50, %v1069_v37  ;;  %v1085_v54 = vadd.f32 %v1082_v51, %v1081_v40 }
 0x5a5   :  { %v1073_v56 = vadd.f32 %v1072_v53, %v1070_v49  ;;  %v1086_v57 = vadd.f32 %v1085_v54, %v1083_v52 }
 0x5a7   :  { %v1074_v58 = vrot.slane %v1073_v56, 4  ;;  %v1087_v59 = vadd.f32 %v1086_v57, %v1084_v55 }
 0x5a9   :  { %v1075_v41 = vadd.f32 %v1074_v58, %v1073_v56  ;;  %v1088_v36 = vrot.slane %v1087_v59, 4 }
 0x5ab   :  { %v1076_v60 = vrot.slane %v1075_v41, 2  ;;  %v1089_v1 = vadd.f32 %v1088_v36, %v1087_v59 }
 0x5ad   :  { %v1077_v44 = vadd.f32 %v1076_v60, %v1075_v41  ;;  %v1090_v2 = vrot.slane %v1089_v1, 2 }
 0x5af   :  { %v1078_v43 = vrot.slane %v1077_v44, 1  ;;  %v1091_v39 = vadd.f32 %v1090_v2, %v1089_v1 }
 0x5b1   :  { %v1079_v3 = vadd.f32 %v1078_v43, %v1077_v44  ;;  %v1092_v48 = vrot.slane %v1091_v39, 1 }
 0x5b3   :  { %v1080_v4 = vmul.f32 0.03125, %v1079_v3  ;;  %v1093_v5 = vadd.f32 %v1092_v48, %v1091_v39 }
 0x5b5   :  { %v1094_v6 = vmul.f32 0.03125, %v1093_v5  ;;  %v1096_v28 = vsub.f32 %v1068_v47, %v1080_v4  ;;  %v1099_v7 = vmul.f32 %v1080_v4, %v1080_v4  ;;  %v1095_v32 = vsub.f32 %v1067_v30, %v1080_v4  ;;  %v2526_v30 = vld [vmem:[%s3320_s3 + $0x58] sm:$0xff]   ;;  %v1253_v47 = vpop.permute.xlu1 %1252 }
 0x5b6   :  { %v1097_v61 = vsub.f32 %v1069_v37, %v1080_v4  ;;  %v1098_v8 = vsub.f32 %v1070_v49, %v1080_v4  ;;  %v1248_v37 = vpop.permute.xlu0 %1247 }
 0x5b7   :  { %v1100_v63 = vsub.f32 %v1094_v6, %v1099_v7 }
 0x5b9   :  { %v1101_v35 = vadd.f32 1e-05, %v1100_v63  ;;  %v1263_v49 = vpop.permute.xlu1 %1262 }
 0x5ba   :  { %v1258_v40 = vpop.permute.xlu0 %1257 }
 0x5bb   :  { %2566 = vrsqrt.f32 %v1101_v35 }
 0x5bd   :  { %v1273_v51 = vpop.permute.xlu1 %1272 }
 0x5be   :  { %v1268_v50 = vpop.permute.xlu0 %1267 }
 0x5c1   :  { %v1223_v57 = vpop.permute.xlu1 %1222 }
 0x5c2   :  { %v1218_v54 = vpop.permute.xlu0 %1217 }
 0x5c5   :  { %v2567_v38 = vpop.eup %2566  ;;  %v1233_v1 = vpop.permute.xlu1 %1232 }
 0x5c6   :  { %v1104_v13 = vmul.f32 %v2567_v38, %v1096_v28  ;;  %v1103_v14 = vmul.f32 %v2567_v38, %v1095_v32  ;;  %v1105_v15 = vmul.f32 %v2567_v38, %v1097_v61  ;;  %v1106_v16 = vmul.f32 %v2567_v38, %v1098_v8  ;;  %v1228_v58 = vpop.permute.xlu0 %1227  ;;  %v2247_v38 = vld [vmem:[%s3319_s9 + $0x1d0] sm:$0xff] }
 0x5c8   :  { %v1127_v24 = vmul.f32 %v1110_v9, %v1103_v14  ;;  %v1128_v42 = vmul.f32 %v1115_v10, %v1104_v13  ;;  %v1129_v17 = vmul.f32 %v1120_v12, %v1105_v15  ;;  %v1130_v18 = vmul.f32 %v1125_v0, %v1106_v16  ;;  %v2245_v12 = vld [vmem:[%s3319_s9 + $0x1c0] sm:$0xff]  ;;  %v2246_v0 = vld [vmem:[%s3319_s9 + $0x1c8] sm:$0xff]  ;;  %v2248_v13 = vld [vmem:[%s3319_s9 + $0x1d8] sm:$0xff] }
 0x5c9   :  { %v2249_v14 = vld [vmem:[%s3319_s9 + $0x1e0] sm:$0xff]  ;;  %v2250_v15 = vld [vmem:[%s3319_s9 + $0x1e8] sm:$0xff] }
 0x5ca   :  { %v3049_v45 = vadd.f32 %v1134_v62, %v1127_v24  ;;  %v3051_v21 = vadd.f32 %v1139_v11, %v1128_v42  ;;  %v3053_v22 = vadd.f32 %v1144_v19, %v1129_v17  ;;  %v3055_v23 = vadd.f32 %v1149_v20, %v1130_v18  ;;  %v2253_v16 = vld [vmem:[%s3319_s9 + $0x200] sm:$0xff]  ;;  %v2254_v24 = vld [vmem:[%s3319_s9 + $0x208] sm:$0xff]  ;;  %v2251_v42 = vld [vmem:[%s3319_s9 + $0x1f0] sm:$0xff] }
 0x5cb   :  { %v2252_v17 = vld [vmem:[%s3319_s9 + $0x1f8] sm:$0xff]  ;;  %v2255_v18 = vld [vmem:[%s3319_s9 + $0x210] sm:$0xff]  ;;  %v2257_v20 = vld [vmem:[%s3319_s9 + $0x220] sm:$0xff] }
 0x5cc   :  { %v1213_v31 = vpack.c.bf16 %v3051_v21, %v3049_v45  ;;  %v1214_v25 = vpack.c.bf16 %v3055_v23, %v3053_v22  ;;  %v2256_v19 = vld [vmem:[%s3319_s9 + $0x218] sm:$0xff] }
 0x5ce   :  { %2443 = vmatprep.subr.bf16.mxu0 %v1213_v31 }
 0x5cf   :  { %2444 = vmatpush3.bf16.msra.mxu0 %v1213_v31  ;;  %v2258_v31 = vld [vmem:[%s3319_s9 + $0x228] sm:$0xff] }
 0x5d0   :  { %2445 = vmatprep.subr.bf16.mxu0 %v1214_v25 }
 0x5d3   :  { %2446 = vmatpush3.bf16.msra.mxu0 %v1214_v25  ;;  %v2259_v25 = vld [vmem:[%s3319_s9 + $0x230] sm:$0xff] }
 0x5d6   :  { %2448 = vmatmul.mubr.msk.bf16.vlgmr.msra.gmra.mrb[16].mxu0 %vm415_vm1, %v2522_v26  ;;  %v2260_v26 = vld [vmem:[%s3319_s9 + $0x238] sm:$0xff] }
 0x5d7   :  { %2451 = vmatprep.mubr.msk.bf16.mxu0 %vm415_vm1, %v2523_v27  ;;  %v2527_v27 = vld [vmem:[%s3322_s4 + $0x10] sm:$0xff]  }
 0x5d8   :  { %2463 = vmatprep.mubr.msk.bf16.mxu1 %vm415_vm1, %v2527_v27 }
 0x5de   :  { %2452 = vmatmul.mubr.msk.bf16.gmra.mrb[20].mxu0 %vm415_vm1, %v2524_v29  ;;  %v2261_v29 = vld [vmem:[%s3319_s9 + $0x240] sm:$0xff] }
 0x5df   :  { %2455 = vmatprep.mubr.msk.bf16.mxu0 %vm415_vm1, %v2525_v46  ;;  %v2262_v46 = vld [vmem:[%s3319_s9 + $0x248] sm:$0xff] }
 0x5e6   :  { %2456 = vmatmul.mubr.msk.bf16.gmra.mrb[24].mxu0 %vm415_vm1, %v2526_v30  ;;  %v2263_v30 = vld [vmem:[%s3319_s9 + $0x250] sm:$0xff] }
 0x6a9   :  { %v2449_v52 = vpop.f32.mrb[16].mxu0 }
 0x6aa   :  { %v1357_v53 = vpop.f32.mrb[17].mxu0  ;;  %v3081_v41 = vadd.f32 %v2449_v52, %v1228_v58  ;;  %v2273_v52 = vld [vmem:[%s3319_s9 + $0x2a0] sm:$0xff]  ;;  %v49_v58 = vld [vmem:[%s3318_s8 + $0x68] sm:$0xff] }
 0x6ab   :  { %v2450_v55 = vpop.f32.mrb[18].mxu0  ;;  %v3083_v44 = vadd.f32 %v1357_v53, %v1218_v54  ;;  %v2274_v53 = vld [vmem:[%s3319_s9 + $0x2a8] sm:$0xff]  ;;  %v2272_v54 = vld [vmem:[%s3319_s9 + $0x298] sm:$0xff] }
 0x6ac   :  { %v1360_v56 = vpop.f32.mrb[19].mxu0  ;;  %v3085_v39 = vadd.f32 %v2450_v55, %v1233_v1  ;;  %v2275_v55 = vld [vmem:[%s3319_s9 + $0x2b0] sm:$0xff]  ;;  %v53_v1 = vld [vmem:[%s3318_s8 + $0x88] sm:$0xff] }
 0x6ad   :  { %v3090_v5 = vadd.f32 %v1360_v56, %v1223_v57  ;;  %v2276_v56 = vld [vmem:[%s3319_s9 + $0x2b8] sm:$0xff]  ;;  %v48_v57 = vld [vmem:[%s3318_s8 + $0x60] sm:$0xff] }
 0x6b1   :  { %v2453_v59 = vpop.f32.mrb[20].mxu0 }
 0x6b2   :  { %v1382_v36 = vadd.f32 %v2453_v59, %v1248_v37  ;;  %v1373_v60 = vpop.f32.mrb[21].mxu0  ;;  %v2266_v37 = vld [vmem:[%s3319_s9 + $0x268] sm:$0xff]  ;;  %v50_v59 = vld [vmem:[%s3318_s8 + $0x70] sm:$0xff] }
 0x6b3   :  { %v1374_v2 = vadd.f32 %v1373_v60, %v1238_v33  ;;  %v2454_v43 = vpop.f32.mrb[22].mxu0  ;;  %v2264_v33 = vld [vmem:[%s3319_s9 + $0x258] sm:$0xff]  ;;  %v52_v60 = vld [vmem:[%s3318_s8 + $0x80] sm:$0xff] }
 0x6b4   :  { %v3088_v3 = vmul.f32 %v1382_v36, %v3081_v41  ;;  %v1385_v48 = vadd.f32 %v2454_v43, %v1253_v47  ;;  %v1376_v4 = vpop.f32.mrb[23].mxu0  ;;  %v2267_v47 = vld [vmem:[%s3319_s9 + $0x270] sm:$0xff] }
 0x6b5   :  { %v3093_v6 = vmul.f32 %v1374_v2, %v3083_v44  ;;  %v1377_v28 = vadd.f32 %v1376_v4, %v1243_v34  ;;  %1432 = vrot.lane.b32.xlu0 %v1374_v2, %s2601_s23  ;;  %v2265_v34 = vld [vmem:[%s3319_s9 + $0x260] sm:$0xff] }
 0x6b6   :  { %v3097_v7 = vmul.f32 %v1385_v48, %v3085_v39  ;;  %v1420_v4 = vrot.slane %v3088_v3, 4 }
 0x6b7   :  { %v3100_v32 = vmul.f32 %v1377_v28, %v3090_v5  ;;  %1434 = vrot.lane.b32.xlu1 %v1377_v28, %s2601_s23  ;;  %v1408_v2 = vrot.slane %v3093_v6, 4 }
 0x6b9   :  { %v2457_v61 = vpop.f32.mrb[24].mxu0  ;;  %1436 = vrot.lane.b32.xlu0 %v1382_v36, %s2601_s23  ;;  %v51_v36 = vld [vmem:[%s3318_s8 + $0x78] sm:$0xff]  ;;  %v1414_v43 = vrot.slane %v3100_v32, 4 }
 0x6ba   :  { %v1389_v8 = vpop.f32.mrb[25].mxu0  ;;  %v3111_v62 = vadd.f32 %v2457_v61, %v1268_v50  ;;  %v2270_v50 = vld [vmem:[%s3319_s9 + $0x288] sm:$0xff] }
 0x6bb   :  { %v3104_v9 = vadd.f32 %v1389_v8, %v1258_v40  ;;  %v2458_v10 = vpop.f32.mrb[26].mxu0  ;;  %1438 = vrot.lane.b32.xlu1 %v1385_v48, %s2601_s23  ;;  %v2268_v40 = vld [vmem:[%s3319_s9 + $0x278] sm:$0xff]  ;;  %v1409_v48 = vadd.f32 %v1408_v2, %v3093_v6  ;;  %v1415_v28 = vadd.f32 %v1414_v43, %v3100_v32  ;;  %v1426_v8 = vrot.slane %v3097_v7, 4 }
 0x6bc   :  { %v1392_v63 = vpop.f32.mrb[27].mxu0  ;;  %v3115_v11 = vadd.f32 %v2458_v10, %v1273_v51  ;;  %v2271_v51 = vld [vmem:[%s3319_s9 + $0x290] sm:$0xff] }
 0x6bd   :  { %v3107_v35 = vadd.f32 %v1392_v63, %v1263_v49  ;;  %1440 = vrot.lane.b32.xlu0 %v3104_v9, %s2601_s23  ;;  %v2269_v49 = vld [vmem:[%s3319_s9 + $0x280] sm:$0xff]  ;;  %v1410_v61 = vrot.slane %v1409_v48, 2  ;;  %v1427_v6 = vadd.f32 %v1426_v8, %v3097_v7 }
 0x6bf   :  { %1442 = vrot.lane.b32.xlu1 %v3107_v35, %s2601_s23 }
 0x6c1   :  { %1444 = vrot.lane.b32.xlu0 %v3111_v62, %s2601_s23 }
 0x6c3   :  { %1446 = vrot.lane.b32.xlu1 %v3115_v11, %s2601_s23 }
 0x6c5   :  { %1537 = vperm.xlu0 %2503, %v2245_v12   ;;  %v1421_v12 = vadd.f32 %v1420_v4, %v3088_v3 }
 0x6c7   :  { %1542 = vperm.xlu1 %2504, %v2246_v0   ;;  %v1416_v0 = vrot.slane %v1415_v28, 2 }
 0x6c9   :  { %1547 = vperm.xlu0 %2503, %v2247_v38  }
 0x6cb   :  { %1552 = vperm.xlu1 %2504, %v2248_v13  }
 0x6cd   :  { %1662 = vperm.xlu0 %2503, %v2249_v14  }
 0x6cf   :  { %1667 = vperm.xlu1 %2504, %v2250_v15   ;;  %v1411_v15 = vadd.f32 %v1410_v61, %v1409_v48 }
 0x6d1   :  { %1686 = vperm.xlu0 %2503, %v2253_v16  }
 0x6d3   :  { %1691 = vperm.xlu1 %2504, %v2254_v24  }
 0x6d5   :  { %1672 = vperm.xlu0 %2503, %v2251_v42  }
 0x6d7   :  { %1677 = vperm.xlu1 %2504, %v2252_v17   ;;  %v1422_v17 = vrot.slane %v1421_v12, 2 }
 0x6d9   :  { %1696 = vperm.xlu0 %2503, %v2255_v18   ;;  %v1417_v18 = vadd.f32 %v1416_v0, %v1415_v28  ;;  %v1423_v7 = vadd.f32 %v1422_v17, %v1421_v12 }
 0x6db   :  { %1701 = vperm.xlu1 %2504, %v2256_v19  }
 0x6dd   :  { %1721 = vperm.xlu0 %2503, %v2257_v20  }
 0x6df   :  { %1726 = vperm.xlu1 %2504, %v2258_v31  }
 0x6e1   :  { %1731 = vperm.xlu0 %2503, %v2259_v25   ;;  %v1412_v25 = vrot.slane %v1411_v15, 1 }
 0x6e3   :  { %1736 = vperm.xlu1 %2504, %v2260_v26   ;;  %v1428_v26 = vrot.slane %v1427_v6, 2 }
 0x6e5   :  { %1741 = vperm.xlu0 %2503, %v2261_v29  }
 0x6e7   :  { %1746 = vperm.xlu1 %2504, %v2262_v46  }
 0x6e9   :  { %1751 = vperm.xlu0 %2503, %v2263_v30   ;;  %v1418_v30 = vrot.slane %v1417_v18, 1 }
 0x6eb   :  { %1756 = vperm.xlu1 %2504, %v2264_v33  }
 0x6ed   :  { %1875 = vperm.xlu0 %2503, %v2265_v34  }
 0x6ef   :  { %1880 = vperm.xlu1 %2504, %v2266_v37  }
 0x6f1   :  { %1885 = vperm.xlu0 %2503, %v2267_v47   ;;  %v1413_v47 = vadd.f32 %v1412_v25, %v1411_v15 }
 0x6f3   :  { %1890 = vperm.xlu1 %2504, %v2268_v40   ;;  %v1429_v40 = vadd.f32 %v1428_v26, %v1427_v6 }
 0x6f5   :  { %2000 = vperm.xlu0 %2503, %v2269_v49  }
 0x6f7   :  { %2005 = vperm.xlu1 %2504, %v2270_v50  }
 0x6f9   :  { %2010 = vperm.xlu0 %2503, %v2271_v51  }
 0x6fb   :  { %2024 = vperm.xlu1 %2504, %v2273_v52  }
 0x6fd   :  { %2029 = vperm.xlu0 %2503, %v2274_v53   ;;  %v1424_v53 = vrot.slane %v1423_v7, 1 }
 0x6ff   :  { %2015 = vperm.xlu1 %2504, %v2272_v54   ;;  %v1425_v2 = vadd.f32 %v1424_v53, %v1423_v7 }
 0x701   :  { %2034 = vperm.xlu0 %2503, %v2275_v55  }
 0x703   :  { %2039 = vperm.xlu1 %2504, %v2276_v56  }
 0x705   :  { %2088 = vperm.xlu0 %2503, %v48_v57  }
 0x707   :  { %2093 = vperm.xlu1 %2504, %v49_v58   ;;  %v1430_v58 = vrot.slane %v1429_v40, 1 }
 0x709   :  { %2173 = vperm.xlu0 %2503, %v50_v59   ;;  %v1431_v8 = vadd.f32 %v1430_v58, %v1429_v40 }
 0x70b   :  { %2178 = vperm.xlu1 %2504, %v51_v36  }
 0x70d   :  { %2185 = vperm.xlu0 %2503, %v52_v60  }
 0x70f   :  { %2190 = vperm.xlu1 %2504, %v53_v1  }
 0x727   :  { %v1433_v10 = vpop.permute.xlu0 %1432 }
 0x728   :  { %v1448_v63 = vmul.f32 %v1433_v10, %v3083_v44 }
 0x729   :  { %v1435_v38 = vpop.permute.xlu1 %1434 }
 0x72a   :  { %v1452_v13 = vrot.slane %v1448_v63, 4  ;;  %v1449_v14 = vmul.f32 %v1435_v38, %v3090_v5 }
 0x72b   :  { %v1437_v16 = vpop.permute.xlu0 %1436 }
 0x72c   :  { %v1453_v24 = vadd.f32 %v1452_v13, %v1448_v63  ;;  %v1458_v42 = vrot.slane %v1449_v14, 4  ;;  %v1450_v32 = vmul.f32 %v1437_v16, %v3081_v41 }
 0x72d   :  { %v1439_v19 = vpop.permute.xlu1 %1438 }
 0x72e   :  { %v1454_v20 = vrot.slane %v1453_v24, 2  ;;  %v1459_v44 = vadd.f32 %v1458_v42, %v1449_v14  ;;  %v1464_v31 = vrot.slane %v1450_v32, 4  ;;  %v1451_v3 = vmul.f32 %v1439_v19, %v3085_v39 }
 0x72f   :  { %v1419_v39 = vadd.f32 %v1418_v30, %v1417_v18  ;;  %v1441_v18 = vpop.permute.xlu0 %1440 }
 0x730   :  { %v1455_v27 = vadd.f32 %v1454_v20, %v1453_v24  ;;  %v1460_v5 = vrot.slane %v1459_v44, 2  ;;  %v1465_v29 = vadd.f32 %v1464_v31, %v1450_v32  ;;  %v1470_v46 = vrot.slane %v1451_v3, 4 }
 0x731   :  { %v1443_v25 = vpop.permute.xlu1 %1442 }
 0x732   :  { %v1456_v33 = vrot.slane %v1455_v27, 1  ;;  %v1461_v34 = vadd.f32 %v1460_v5, %v1459_v44  ;;  %v1466_v37 = vrot.slane %v1465_v29, 2  ;;  %v1471_v41 = vadd.f32 %v1470_v46, %v1451_v3 }
 0x734   :  { %v1457_v49 = vadd.f32 %v1456_v33, %v1455_v27  ;;  %v1462_v50 = vrot.slane %v1461_v34, 1  ;;  %v1467_v51 = vadd.f32 %v1466_v37, %v1465_v29  ;;  %v1472_v52 = vrot.slane %v1471_v41, 2  ;;  %v1445_v37 = vpop.permute.xlu0 %1444 }
 0x736   :  { %v1476_v54 = vmax.f32 %v1413_v47, %v1457_v49  ;;  %v1463_v55 = vadd.f32 %v1462_v50, %v1461_v34  ;;  %v1468_v56 = vrot.slane %v1467_v51, 1  ;;  %v1473_v57 = vadd.f32 %v1472_v52, %v1471_v41  ;;  %v1447_v50 = vpop.permute.xlu1 %1446 }
 0x738   :  { %v1480_v59 = vsub.f32 %v1413_v47, %v1476_v54  ;;  %v1492_v36 = vsub.f32 %v1457_v49, %v1476_v54  ;;  %v1477_v60 = vmax.f32 %v1419_v39, %v1463_v55  ;;  %v1469_v1 = vadd.f32 %v1468_v56, %v1467_v51 }
 0x739   :  { %v1474_v43 = vrot.slane %v1473_v57, 1 }
 0x73a   :  { %v1484_v48 = vmul.f32 1.442695, %v1480_v59  ;;  %v1496_v4 = vmul.f32 1.442695, %v1492_v36  ;;  %v1481_v28 = vsub.f32 %v1419_v39, %v1477_v60  ;;  %v1493_v61 = vsub.f32 %v1463_v55, %v1477_v60 }
 0x73b   :  { %v1478_v10 = vmax.f32 %v1425_v2, %v1469_v1  ;;  %v1475_v63 = vadd.f32 %v1474_v43, %v1473_v57 }
 0x73c   :  { %2568 = vpow2.f32 %v1484_v48  ;;  %v1486_v12 = vmul.f32 1.442695, %v1481_v28  ;;  %v1498_v0 = vmul.f32 1.442695, %v1493_v61 }
 0x73d   :  { %2570 = vpow2.f32 %v1496_v4  ;;  %v1482_v38 = vsub.f32 %v1425_v2, %v1478_v10  ;;  %v1494_v13 = vsub.f32 %v1469_v1, %v1478_v10  ;;  %v1479_v14 = vmax.f32 %v1431_v8, %v1475_v63  ;;  %v2529_v1 = vld [vmem:[%s3323_s5 + $0x20] sm:$0xff]  }
 0x73e   :  { %2572 = vpow2.f32 %v1486_v12 }
 0x73f   :  { %2574 = vpow2.f32 %v1498_v0  ;;  %v1488_v15 = vmul.f32 1.442695, %v1482_v38  ;;  %v1500_v6 = vmul.f32 1.442695, %v1494_v13  ;;  %v1483_v16 = vsub.f32 %v1431_v8, %v1479_v14 }
 0x740   :  { %v1495_v24 = vsub.f32 %v1475_v63, %v1479_v14 }
 0x741   :  { %2576 = vpow2.f32 %v1488_v15  ;;  %v1490_v42 = vmul.f32 1.442695, %v1483_v16 }
 0x742   :  { %2578 = vpow2.f32 %v1500_v6  ;;  %v1502_v32 = vmul.f32 1.442695, %v1495_v24 }
 0x743   :  { %2580 = vpow2.f32 %v1490_v42 }
 0x744   :  { %2582 = vpow2.f32 %v1502_v32  ;;  %v1538_v2 = vpop.permute.xlu0 %1537 }
 0x746   :  { %v2569_v17 = vpop.eup %2568  ;;  %v1543_v43 = vpop.permute.xlu1 %1542 }
 0x747   :  { %v2571_v19 = vpop.eup %2570  ;;  %v1512_v20 = vmul.f32 %v2569_v17, %v3104_v9 }
 0x748   :  { %v2573_v44 = vpop.eup %2572  ;;  %v1504_v31 = vadd.f32 %v2571_v19, %v2569_v17  ;;  %v1516_v3 = vmul.f32 %v2571_v19, %v1441_v18  ;;  %v1548_v4 = vpop.permute.xlu0 %1547 }
 0x749   :  { %v2575_v26 = vpop.eup %2574  ;;  %v1513_v27 = vmul.f32 %v2573_v44, %v3107_v35 }
 0x74a   :  { %2584 = vrcp.f32 %v1504_v31  ;;  %v1520_v5 = vadd.f32 %v1516_v3, %v1512_v20  ;;  %v1505_v29 = vadd.f32 %v2575_v26, %v2573_v44  ;;  %v1517_v46 = vmul.f32 %v2575_v26, %v1443_v25  ;;  %v1553_v63 = vpop.permute.xlu1 %1552 }
 0x74b   :  { %v2577_v7 = vpop.eup %2576 }
 0x74c   :  { %v2579_v30 = vpop.eup %2578  ;;  %2586 = vrcp.f32 %v1505_v29  ;;  %v1521_v33 = vadd.f32 %v1517_v46, %v1513_v27  ;;  %v1514_v34 = vmul.f32 %v2577_v7, %v3111_v62 }
 0x74d   :  { %v2581_v41 = vpop.eup %2580  ;;  %v1506_v9 = vadd.f32 %v2579_v30, %v2577_v7  ;;  %v1518_v47 = vmul.f32 %v2579_v30, %v1445_v37 }
 0x74e   :  { %v2583_v40 = vpop.eup %2582  ;;  %v1515_v49 = vmul.f32 %v2581_v41, %v3115_v11  ;;  %v2528_v11 = vld [vmem:[%s3322_s4 + $0x18] sm:$0xff]  }
 0x74f   :  { %2588 = vrcp.f32 %v1506_v9  ;;  %v1522_v35 = vadd.f32 %v1518_v47, %v1514_v34  ;;  %v1507_v51 = vadd.f32 %v2583_v40, %v2581_v41  ;;  %v1519_v52 = vmul.f32 %v2583_v40, %v1447_v50  ;;  %v1663_v40 = vpop.permute.xlu0 %1662 }
 0x751   :  { %2590 = vrcp.f32 %v1507_v51  ;;  %v1523_v53 = vadd.f32 %v1519_v52, %v1515_v49  ;;  %v1668_v49 = vpop.permute.xlu1 %1667 }
 0x753   :  { %v1687_v51 = vpop.permute.xlu0 %1686 }
 0x754   :  { %v2585_v39 = vpop.eup %2584 }
 0x755   :  { %v1524_v54 = vmul.f32 %v2585_v39, %v1520_v5  ;;  %v1692_v52 = vpop.permute.xlu1 %1691 }
 0x756   :  { %v2587_v55 = vpop.eup %2586 }
 0x757   :  { %v1525_v56 = vmul.f32 %v2587_v55, %v1521_v33 }
 0x759   :  { %v2589_v57 = vpop.eup %2588  ;;  %v1533_v62 = vpack.c.bf16 %v1525_v56, %v1524_v54  ;;  %v1678_v39 = vpop.permute.xlu1 %1677 }
 0x75a   :  { %v1526_v58 = vmul.f32 %v2589_v57, %v1522_v35 }
 0x75b   :  { %v2591_v59 = vpop.eup %2590  ;;  %2459 = vmatprep.subr.bf16.mxu1 %v1533_v62 }
 0x75c   :  { %v1527_v36 = vmul.f32 %v2591_v59, %v1523_v53  ;;  %2460 = vmatpush3.bf16.msra.mxu1 %v1533_v62  ;;  %v1673_v53 = vpop.permute.xlu0 %1672 }
 0x75e   :  { %v1534_v60 = vpack.c.bf16 %v1527_v36, %v1526_v58 }
 0x760   :  { %2461 = vmatprep.subr.bf16.mxu1 %v1534_v60 }
 0x761   :  { %2462 = vmatpush3.bf16.msra.mxu1 %v1534_v60 }
 0x764   :  { %2464 = vmatmul.mubr.msk.bf16.vlgmr.msra.gmra.mrb[16].mxu1 %vm415_vm1, %v2528_v11  ;;  %v1697_v11 = vpop.permute.xlu0 %1696 }
 0x765   :  { %2471 = vmatprep.mubr.msk.bf16.mxu1 %vm415_vm1, %v2529_v1  ;;  %v1702_v1 = vpop.permute.xlu1 %1701 }
 0x837   :  { %v2465_v48 = vpop.f32.mrb[16].mxu1 }
 0x838   :  { %v1605_v28 = vpop.f32.mrb[17].mxu1  ;;  %v1614_v61 = vadd.f32 %v2465_v48, %v1548_v4 }
 0x839   :  { %v1606_v8 = vadd.f32 %v1605_v28, %v1538_v2  ;;  %v2466_v10 = vpop.f32.mrb[18].mxu1 }
 0x83a   :  { %v1608_v12 = vpop.f32.mrb[19].mxu1  ;;  %v1617_v38 = vadd.f32 %v2466_v10, %v1553_v63  ;;  %v1622_v14 = vadd.f32 %v1614_v61, %v3053_v22  ;;  %v2531_v10 = vld [vmem:[%s3323_s5 + $0x30] sm:$0xff]   ;;  %v2532_v63 = vld [vmem:[%s3323_s5 + $0x38] sm:$0xff]  }
 0x83b   :  { %v1620_v0 = vadd.f32 %v1606_v8, %v3049_v45  ;;  %v1609_v13 = vadd.f32 %v1608_v12, %v1543_v43  ;;  %v2530_v8 = vld [vmem:[%s3323_s5 + $0x28] sm:$0xff]   ;;  %v2533_v12 = vld [vmem:[%s3324_s6 + $0x10] sm:$0xff]  }
 0x83c   :  { %v1623_v16 = vadd.f32 %v1617_v38, %v3055_v23  ;;  %v1636_v32 = vmul.f32 %v1622_v14, %v1622_v14  ;;  %2487 = vmatprep.mubr.msk.bf16.mxu0 %vm1011_vm2, %v2533_v12  ;;  %v1727_v38 = vpop.permute.xlu1 %1726 }
 0x83d   :  { %v1621_v15 = vadd.f32 %v1609_v13, %v3051_v21  ;;  %v1634_v6 = vmul.f32 %v1620_v0, %v1620_v0 }
 0x83e   :  { %v1637_v19 = vmul.f32 %v1623_v16, %v1623_v16 }
 0x83f   :  { %v1624_v24 = vadd.f32 %v1621_v15, %v1620_v0  ;;  %v1635_v42 = vmul.f32 %v1621_v15, %v1621_v15 }
 0x841   :  { %v1625_v17 = vadd.f32 %v1624_v24, %v1622_v14  ;;  %v1638_v18 = vadd.f32 %v1635_v42, %v1634_v6 }
 0x843   :  { %v1626_v20 = vadd.f32 %v1625_v17, %v1623_v16  ;;  %v1639_v44 = vadd.f32 %v1638_v18, %v1636_v32 }
 0x845   :  { %v1627_v31 = vrot.slane %v1626_v20, 4  ;;  %v1640_v3 = vadd.f32 %v1639_v44, %v1637_v19 }
 0x847   :  { %v1628_v45 = vadd.f32 %v1627_v31, %v1626_v20  ;;  %v1641_v25 = vrot.slane %v1640_v3, 4 }
 0x849   :  { %v1629_v26 = vrot.slane %v1628_v45, 2  ;;  %v1642_v27 = vadd.f32 %v1641_v25, %v1640_v3 }
 0x84b   :  { %v1630_v22 = vadd.f32 %v1629_v26, %v1628_v45  ;;  %v1643_v5 = vrot.slane %v1642_v27, 2 }
 0x84d   :  { %v1631_v21 = vrot.slane %v1630_v22, 1  ;;  %v1644_v29 = vadd.f32 %v1643_v5, %v1642_v27 }
 0x84f   :  { %v1632_v46 = vadd.f32 %v1631_v21, %v1630_v22  ;;  %v1645_v23 = vrot.slane %v1644_v29, 1 }
 0x851   :  { %v1633_v7 = vmul.f32 0.03125, %v1632_v46  ;;  %v1646_v30 = vadd.f32 %v1645_v23, %v1644_v29 }
 0x853   :  { %v1647_v33 = vmul.f32 0.03125, %v1646_v30  ;;  %v1649_v34 = vsub.f32 %v1621_v15, %v1633_v7  ;;  %v1652_v37 = vmul.f32 %v1633_v7, %v1633_v7  ;;  %v1648_v41 = vsub.f32 %v1620_v0, %v1633_v7  ;;  %v1722_v0 = vpop.permute.xlu0 %1721 }
 0x854   :  { %v1650_v9 = vsub.f32 %v1622_v14, %v1633_v7  ;;  %v1651_v47 = vsub.f32 %v1623_v16, %v1633_v7  ;;  %v1737_v14 = vpop.permute.xlu1 %1736 }
 0x855   :  { %v1653_v50 = vsub.f32 %v1647_v33, %v1652_v37 }
 0x857   :  { %v1654_v35 = vadd.f32 1e-05, %v1653_v50  ;;  %v1732_v13 = vpop.permute.xlu0 %1731  ;;  %v2602_v50 = vmov 0.0  }
 0x858   :  { %v1747_v19 = vpop.permute.xlu1 %1746 }
 0x859   :  { %2592 = vrsqrt.f32 %v1654_v35 }
 0x85b   :  { %v1742_v24 = vpop.permute.xlu0 %1741 }
 0x85c   :  { %v1757_v29 = vpop.permute.xlu1 %1756 }
 0x85f   :  { %v1752_v26 = vpop.permute.xlu0 %1751 }
 0x863   :  { %v2593_v54 = vpop.eup %2592  ;;  %v1876_v35 = vpop.permute.xlu0 %1875 }
 0x864   :  { %v1657_v55 = vmul.f32 %v2593_v54, %v1649_v34  ;;  %v1656_v56 = vmul.f32 %v2593_v54, %v1648_v41  ;;  %v1658_v57 = vmul.f32 %v2593_v54, %v1650_v9  ;;  %v1659_v62 = vmul.f32 %v2593_v54, %v1651_v47 }
 0x866   :  { %v1680_v58 = vmul.f32 %v1663_v40, %v1656_v56  ;;  %v1681_v59 = vmul.f32 %v1668_v49, %v1657_v55  ;;  %v1682_v36 = vmul.f32 %v1673_v53, %v1658_v57  ;;  %v1683_v60 = vmul.f32 %v1678_v39, %v1659_v62  ;;  %v2534_v49 = vld [vmem:[%s3324_s6 + $0x18] sm:$0xff]  }
 0x867   :  { %v1886_v53 = vpop.permute.xlu0 %1885 }
 0x868   :  { %v3267_v2 = vadd.f32 %v1687_v51, %v1680_v58  ;;  %v3269_v43 = vadd.f32 %v1692_v52, %v1681_v59  ;;  %v3271_v48 = vadd.f32 %v1697_v11, %v1682_v36  ;;  %v3273_v4 = vadd.f32 %v1702_v1, %v1683_v60  ;;  %v1881_v51 = vpop.permute.xlu1 %1880 }
 0x86a   :  { %v1717_v28 = vpack.c.bf16 %v3269_v43, %v3267_v2  ;;  %v1718_v61 = vpack.c.bf16 %v3273_v4, %v3271_v48 }
 0x86c   :  { %2467 = vmatprep.subr.bf16.mxu1 %v1717_v28  ;;  %v1891_v57 = vpop.permute.xlu1 %1890 }
 0x86d   :  { %2468 = vmatpush3.bf16.msra.mxu1 %v1717_v28 }
 0x86e   :  { %2469 = vmatprep.subr.bf16.mxu1 %v1718_v61 }
 0x871   :  { %2470 = vmatpush3.bf16.msra.mxu1 %v1718_v61 }
 0x872   :  { %2491 = vmatprep.subr.bf16.mxu1 %v2602_v50 }
 0x874   :  { %2472 = vmatmul.mubr.msk.bf16.vlgmr.msra.gmra.mrb[20].mxu1 %vm415_vm1, %v2530_v8 }
 0x875   :  { %2475 = vmatprep.mubr.msk.bf16.mxu1 %vm415_vm1, %v2531_v10 }
 0x87c   :  { %2476 = vmatmul.mubr.msk.bf16.gmra.mrb[24].mxu1 %vm415_vm1, %v2532_v63 }
 0x87d   :  { %2495 = vmatprep.mubr.msk.bf16.mxu1 %vm2603_vm3, %v2602_v50 }
 0x947   :  { %v2473_v15 = vpop.f32.mrb[20].mxu1 }
 0x948   :  { %v1834_v6 = vadd.f32 %v2473_v15, %v1732_v13  ;;  %v1825_v16 = vpop.f32.mrb[21].mxu1 }
 0x949   :  { %v1826_v42 = vadd.f32 %v1825_v16, %v1722_v0  ;;  %v2474_v32 = vpop.f32.mrb[22].mxu1 }
 0x94a   :  { %v1837_v17 = vadd.f32 %v2474_v32, %v1737_v14  ;;  %v1828_v18 = vpop.f32.mrb[23].mxu1  ;;  %v1858_v44 = vmax.f32 %v1834_v6, 0.0 }
 0x94b   :  { %v1829_v20 = vadd.f32 %v1828_v18, %v1727_v38  ;;  %v1856_v3 = vmax.f32 %v1826_v42, 0.0 }
 0x94c   :  { %v1859_v31 = vmax.f32 %v1837_v17, 0.0 }
 0x94d   :  { %v1857_v45 = vmax.f32 %v1829_v20, 0.0 }
 0x94e   :  { %v1870_v25 = vpack.c.bf16 %v1859_v31, %v1858_v44 }
 0x94f   :  { %v1869_v27 = vpack.c.bf16 %v1857_v45, %v1856_v3  ;;  %v2477_v22 = vpop.f32.mrb[24].mxu1 }
 0x950   :  { %v1850_v5 = vadd.f32 %v2477_v22, %v1752_v26  ;;  %v1841_v21 = vpop.f32.mrb[25].mxu1  ;;  %v2001_v26 = vpop.permute.xlu0 %2000 }
 0x951   :  { %v1842_v46 = vadd.f32 %v1841_v21, %v1742_v24  ;;  %v2478_v23 = vpop.f32.mrb[26].mxu1  ;;  %2479 = vmatprep.subr.bf16.mxu0 %v1869_v27  ;;  %v2006_v22 = vpop.permute.xlu1 %2005 }
 0x952   :  { %v1853_v7 = vadd.f32 %v2478_v23, %v1757_v29  ;;  %v1844_v30 = vpop.f32.mrb[27].mxu1  ;;  %2480 = vmatpush3.bf16.msra.mxu0 %v1869_v27  ;;  %v1862_v34 = vmax.f32 %v1850_v5, 0.0 }
 0x953   :  { %v1845_v33 = vadd.f32 %v1844_v30, %v1747_v19  ;;  %2481 = vmatprep.subr.bf16.mxu0 %v1870_v25  ;;  %v1860_v41 = vmax.f32 %v1842_v46, 0.0 }
 0x954   :  { %v1863_v37 = vmax.f32 %v1853_v7, 0.0  ;;  %v2011_v21 = vpop.permute.xlu0 %2010 }
 0x955   :  { %v1861_v9 = vmax.f32 %v1845_v33, 0.0  ;;  %v2025_v29 = vpop.permute.xlu1 %2024 }
 0x956   :  { %v1872_v47 = vpack.c.bf16 %v1863_v37, %v1862_v34  ;;  %2482 = vmatpush3.bf16.msra.mxu0 %v1870_v25 }
 0x957   :  { %v1871_v40 = vpack.c.bf16 %v1861_v9, %v1860_v41 }
 0x958   :  { %v2030_v46 = vpop.permute.xlu0 %2029 }
 0x959   :  { %2483 = vmatprep.subr.bf16.mxu0 %v1871_v40  ;;  %v2016_v7 = vpop.permute.xlu1 %2015 }
 0x95a   :  { %2484 = vmatpush3.bf16.msra.mxu0 %v1871_v40 }
 0x95b   :  { %2485 = vmatprep.subr.bf16.mxu0 %v1872_v47 }
 0x95e   :  { %2486 = vmatpush3.bf16.msra.mxu0 %v1872_v47 }
 0x961   :  { %2488 = vmatmul.mubr.msk.bf16.vlgmr.msra.gmra.mrb[28].mxu0 %vm1011_vm2, %v2534_v49  ;;  %v2035_v49 = vpop.permute.xlu0 %2034 }
 0xa34   :  { %v2489_v52 = vpop.f32.mrb[28].mxu0 }
 0xa35   :  { %v1943_v39 = vpop.f32.mrb[29].mxu0  ;;  %v1952_v54 = vadd.f32 %v2489_v52, %v1886_v53  ;;  %v2040_v53 = vpop.permute.xlu1 %2039 }
 0xa36   :  { %v1944_v55 = vadd.f32 %v1943_v39, %v1876_v35  ;;  %v2490_v56 = vpop.f32.mrb[30].mxu0 }
 0xa37   :  { %v1946_v62 = vpop.f32.mrb[31].mxu0  ;;  %v1955_v59 = vadd.f32 %v2490_v56, %v1891_v57  ;;  %v1960_v60 = vadd.f32 %v1952_v54, %v3271_v48 }
 0xa38   :  { %v1958_v58 = vadd.f32 %v1944_v55, %v3267_v2  ;;  %v1947_v36 = vadd.f32 %v1946_v62, %v1881_v51 }
 0xa39   :  { %v1961_v28 = vadd.f32 %v1955_v59, %v3273_v4  ;;  %v1974_v10 = vmul.f32 %v1960_v60, %v1960_v60 }
 0xa3a   :  { %v1959_v11 = vadd.f32 %v1947_v36, %v3269_v43  ;;  %v1972_v1 = vmul.f32 %v1958_v58, %v1958_v58 }
 0xa3b   :  { %v1975_v0 = vmul.f32 %v1961_v28, %v1961_v28 }
 0xa3c   :  { %v1962_v61 = vadd.f32 %v1959_v11, %v1958_v58  ;;  %v1973_v8 = vmul.f32 %v1959_v11, %v1959_v11 }
 0xa3e   :  { %v1963_v63 = vadd.f32 %v1962_v61, %v1960_v60  ;;  %v1976_v12 = vadd.f32 %v1973_v8, %v1972_v1 }
 0xa40   :  { %v1964_v38 = vadd.f32 %v1963_v63, %v1961_v28  ;;  %v1977_v13 = vadd.f32 %v1976_v12, %v1974_v10 }
 0xa42   :  { %v1965_v14 = vrot.slane %v1964_v38, 4  ;;  %v1978_v15 = vadd.f32 %v1977_v13, %v1975_v0 }
 0xa44   :  { %v1966_v2 = vadd.f32 %v1965_v14, %v1964_v38  ;;  %v1979_v6 = vrot.slane %v1978_v15, 4 }
 0xa46   :  { %v1967_v16 = vrot.slane %v1966_v2, 2  ;;  %v1980_v24 = vadd.f32 %v1979_v6, %v1978_v15 }
 0xa48   :  { %v1968_v48 = vadd.f32 %v1967_v16, %v1966_v2  ;;  %v1981_v42 = vrot.slane %v1980_v24, 2 }
 0xa4a   :  { %v1969_v43 = vrot.slane %v1968_v48, 1  ;;  %v1982_v32 = vadd.f32 %v1981_v42, %v1980_v24 }
 0xa4c   :  { %v1970_v17 = vadd.f32 %v1969_v43, %v1968_v48  ;;  %v1983_v4 = vrot.slane %v1982_v32, 1 }
 0xa4e   :  { %v1971_v18 = vmul.f32 0.03125, %v1970_v17  ;;  %v1984_v19 = vadd.f32 %v1983_v4, %v1982_v32 }
 0xa50   :  { %v1985_v20 = vmul.f32 0.03125, %v1984_v19  ;;  %v1987_v44 = vsub.f32 %v1959_v11, %v1971_v18  ;;  %v1988_v31 = vsub.f32 %v1960_v60, %v1971_v18  ;;  %v1989_v3 = vsub.f32 %v1961_v28, %v1971_v18 }
 0xa51   :  { %v1990_v45 = vmul.f32 %v1971_v18, %v1971_v18  ;;  %v1986_v25 = vsub.f32 %v1958_v58, %v1971_v18 }
 0xa53   :  { %v1991_v27 = vsub.f32 %v1985_v20, %v1990_v45  ;;  %v2535_v45 = vld [vmem:[%s3325_s7] sm:$0xff]  }
 0xa55   :  { %v1992_v5 = vadd.f32 1e-05, %v1991_v27 }
 0xa57   :  { %2594 = vrsqrt.f32 %v1992_v5  ;;  %v2094_v5 = vpop.permute.xlu1 %2093 }
 0xa61   :  { %v2595_v23 = vpop.eup %2594 }
 0xa62   :  { %v1995_v30 = vmul.f32 %v2595_v23, %v1987_v44  ;;  %v1997_v33 = vmul.f32 %v2595_v23, %v1989_v3  ;;  %v1994_v34 = vmul.f32 %v2595_v23, %v1986_v25  ;;  %v1996_v37 = vmul.f32 %v2595_v23, %v1988_v31  ;;  %v2089_v25 = vpop.permute.xlu0 %2088 }
 0xa64   :  { %v2019_v41 = vmul.f32 %v2006_v22, %v1995_v30  ;;  %v2018_v9 = vmul.f32 %v2001_v26, %v1994_v34  ;;  %v2020_v47 = vmul.f32 %v2011_v21, %v1996_v37  ;;  %v2021_v40 = vmul.f32 %v2016_v7, %v1997_v33 }
 0xa66   :  { %v2043_v35 = vadd.f32 %v2030_v46, %v2019_v41  ;;  %v2042_v51 = vadd.f32 %v2025_v29, %v2018_v9  ;;  %v2044_v52 = vadd.f32 %v2035_v49, %v2020_v47  ;;  %v2045_v54 = vadd.f32 %v2040_v53, %v2021_v40 }
 0xa68   :  { %v2059_v39 = vmul.f32 %v2043_v35, %v2043_v35  ;;  %v2048_v55 = vadd.f32 %v2043_v35, %v2042_v51  ;;  %v2058_v56 = vmul.f32 %v2042_v51, %v2042_v51  ;;  %v2060_v62 = vmul.f32 %v2044_v52, %v2044_v52 }
 0xa69   :  { %v2061_v36 = vmul.f32 %v2045_v54, %v2045_v54 }
 0xa6a   :  { %v2049_v57 = vadd.f32 %v2048_v55, %v2044_v52  ;;  %v2062_v58 = vadd.f32 %v2059_v39, %v2058_v56 }
 0xa6c   :  { %v2050_v59 = vadd.f32 %v2049_v57, %v2045_v54  ;;  %v2063_v60 = vadd.f32 %v2062_v58, %v2060_v62 }
 0xa6e   :  { %v2051_v11 = vrot.slane %v2050_v59, 4  ;;  %v2064_v1 = vadd.f32 %v2063_v60, %v2061_v36  ;;  %v2179_v36 = vpop.permute.xlu1 %2178 }
 0xa70   :  { %v2052_v28 = vadd.f32 %v2051_v11, %v2050_v59  ;;  %v2065_v61 = vrot.slane %v2064_v1, 4  ;;  %v2174_v59 = vpop.permute.xlu0 %2173 }
 0xa72   :  { %v2053_v8 = vrot.slane %v2052_v28, 2  ;;  %v2066_v10 = vadd.f32 %v2065_v61, %v2064_v1 }
 0xa74   :  { %v2054_v63 = vadd.f32 %v2053_v8, %v2052_v28  ;;  %v2067_v12 = vrot.slane %v2066_v10, 2  ;;  %v2186_v8 = vpop.permute.xlu0 %2185 }
 0xa76   :  { %v2055_v0 = vrot.slane %v2054_v63, 1  ;;  %v2068_v38 = vadd.f32 %v2067_v12, %v2066_v10  ;;  %v2191_v10 = vpop.permute.xlu1 %2190 }
 0xa78   :  { %v2056_v13 = vadd.f32 %v2055_v0, %v2054_v63  ;;  %v2069_v14 = vrot.slane %v2068_v38, 1 }
 0xa7a   :  { %v2057_v15 = vmul.f32 0.03125, %v2056_v13  ;;  %v2070_v2 = vadd.f32 %v2069_v14, %v2068_v38 }
 0xa7c   :  { %v2071_v6 = vmul.f32 0.03125, %v2070_v2  ;;  %v2072_v16 = vsub.f32 %v2042_v51, %v2057_v15  ;;  %v2073_v24 = vsub.f32 %v2043_v35, %v2057_v15  ;;  %v2076_v48 = vmul.f32 %v2057_v15, %v2057_v15 }
 0xa7d   :  { %v2074_v42 = vsub.f32 %v2044_v52, %v2057_v15  ;;  %v2075_v43 = vsub.f32 %v2045_v54, %v2057_v15 }
 0xa7e   :  { %v2077_v32 = vsub.f32 %v2071_v6, %v2076_v48 }
 0xa80   :  { %v2078_v17 = vadd.f32 1e-05, %v2077_v32 }
 0xa82   :  { %2596 = vrsqrt.f32 %v2078_v17 }
 0xa8c   :  { %v2597_v4 = vpop.eup %2596 }
 0xa8d   :  { %v2080_v18 = vmul.f32 %v2597_v4, %v2072_v16  ;;  %v2081_v19 = vmul.f32 %v2597_v4, %v2073_v24  ;;  %v2082_v20 = vmul.f32 %v2597_v4, %v2074_v42  ;;  %v2083_v44 = vmul.f32 %v2597_v4, %v2075_v43 }
 0xa8f   :  { %v2084_v31 = vpack.c.bf16 %v2081_v19, %v2080_v18  ;;  %v2085_v3 = vpack.c.bf16 %v2083_v44, %v2082_v20 }
 0xa91   :  { %2492 = vmatpush3.bf16.msra.mxu1 %v2084_v31 }
 0xa92   :  { %2493 = vmatprep.subr.bf16.mxu1 %v2602_v50 }
 0xa95   :  { %2494 = vmatpush3.bf16.msra.mxu1 %v2085_v3 }
 0xa98   :  { %2496 = vmatmul.mubr.msk.bf16.vlgmr.msra.gmra.mrb[28].mxu1 %vm415_vm1, %v2535_v45 }
 0xb6b   :  { %v2138_v26 = vpop.f32.mrb[28].mxu1 }
 0xb6c   :  { %v2139_v27 = vadd.f32 %v2138_v26, %v2089_v25  ;;  %v2497_v22 = vpop.f32.mrb[29].mxu1 }
 0xb6d   :  { %v2141_v21 = vpop.f32.mrb[30].mxu1 }
 0xb6e   :  { %v2142_v29 = vadd.f32 %v2141_v21, %v2094_v5  ;;  %v2498_v46 = vpop.f32.mrb[31].mxu1  ;;  %v2153_v23 = vmul.f32 %v2139_v27, %v2139_v27 }
 0xb70   :  { %v2145_v7 = vadd.f32 %v2142_v29, %v2139_v27  ;;  %v2154_v30 = vmul.f32 %v2142_v29, %v2142_v29 }
 0xb72   :  { %v2146_v33 = vrot.slane %v2145_v7, 4  ;;  %v2155_v50 = vadd.f32 %v2154_v30, %v2153_v23 }
 0xb74   :  { %v2147_v34 = vadd.f32 %v2146_v33, %v2145_v7  ;;  %v2156_v37 = vrot.slane %v2155_v50, 4 }
 0xb76   :  { %v2148_v41 = vrot.slane %v2147_v34, 2  ;;  %v2157_v9 = vadd.f32 %v2156_v37, %v2155_v50 }
 0xb78   :  { %v2149_v47 = vadd.f32 %v2148_v41, %v2147_v34  ;;  %v2158_v40 = vrot.slane %v2157_v9, 2 }
 0xb7a   :  { %v2150_v49 = vrot.slane %v2149_v47, 1  ;;  %v2159_v35 = vadd.f32 %v2158_v40, %v2157_v9 }
 0xb7c   :  { %v2151_v51 = vadd.f32 %v2150_v49, %v2149_v47  ;;  %v2160_v52 = vrot.slane %v2159_v35, 1 }
 0xb7e   :  { %v2152_v53 = vmul.f32 0.0625, %v2151_v51  ;;  %v2161_v39 = vadd.f32 %v2160_v52, %v2159_v35 }
 0xb80   :  { %v2162_v54 = vmul.f32 0.0625, %v2161_v39  ;;  %v2163_v55 = vsub.f32 %v2139_v27, %v2152_v53  ;;  %v2164_v56 = vsub.f32 %v2142_v29, %v2152_v53  ;;  %v2165_v57 = vmul.f32 %v2152_v53, %v2152_v53 }
 0xb82   :  { %v2166_v62 = vsub.f32 %v2162_v54, %v2165_v57 }
 0xb84   :  { %v2167_v58 = vadd.f32 1e-05, %v2166_v62 }
 0xb86   :  { %2598 = vrsqrt.f32 %v2167_v58 }
 0xb90   :  { %v2599_v60 = vpop.eup %2598 }
 0xb91   :  { %v2169_v11 = vmul.f32 %v2599_v60, %v2163_v55  ;;  %v2170_v1 = vmul.f32 %v2599_v60, %v2164_v56 }
 0xb93   :  { %v2181_v28 = vmul.f32 %v2174_v59, %v2169_v11  ;;  %v2182_v61 = vmul.f32 %v2179_v36, %v2170_v1 }
 0xb95   :  { %v2193_v63 = vadd.f32 %v2186_v8, %v2181_v28  ;;  %v2194_v12 = vadd.f32 %v2191_v10, %v2182_v61 }
 0xb97   :  { %2195 = vst [vmem:[%s3326_s10] sm:$0xff] %v2193_v63  ;;  %2196 = vst [vmem:[%s3326_s10 + $0x8] sm:$0xff] %v2194_v12 }

</bundles_post_ra>
